<compile_context>
chip_gen: v6e
topology: v6e:2x2x1
jax: 0.10.0
libtpu: 0.0.40
codegen_flags: <defaults>
</compile_context>

<pallas_src>
import math

import jax
import jax.numpy as jnp
from jax import lax
from jax.experimental import pallas as pl
from jax.experimental.pallas import tpu as pltpu


def _news_encoder_kernel(emb_ref, cw_ref, cb_ref, aw_ref, ab_ref, aq_ref,
                         out_ref):
    # emb_ref: (TB, T + K - 1, E)   pre-padded (word axis) title embeddings
    # cw_ref : (K*E, F_pad)         im2col conv weights (k-major rows)
    # cb_ref : (1, F_pad)  f32      conv bias (zero in padded channels)
    # aw_ref : (F_pad, Q)           attention linear weight (pre-transposed)
    # ab_ref : (1, Q)      f32      attention linear bias
    # aq_ref : (1, Q)      f32      attention query vector
    # out_ref: (TB, F_pad) f32
    TB, Tp, E = emb_ref.shape
    KE, F = cw_ref.shape
    Q = aw_ref.shape[1]
    K = KE // E
    T = Tp - (K - 1)

    x = emb_ref[...]                                        # (TB, Tp, E)

    # ---- title CNN as ONE fused im2col matmul (f32 MXU accumulation) ----
    cols = jnp.concatenate([x[:, k:k + T, :] for k in range(K)], axis=-1)
    cols = cols.reshape(TB * T, KE)                         # (TB*T, K*E)
    conv = jnp.dot(cols, cw_ref[...],
                   preferred_element_type=jnp.float32)      # (TB*T, F) f32
    conv = jnp.maximum(conv + cb_ref[...], 0.0)

    # ---- additive attention ----
    temp = jnp.tanh(
        jnp.dot(conv.astype(aw_ref.dtype), aw_ref[...],
                preferred_element_type=jnp.float32)
        + ab_ref[...])                                      # (TB*T, Q) f32

    temp3 = temp.reshape(TB, T, Q)
    scores = jnp.sum(temp3 * aq_ref[...].reshape(1, 1, Q), axis=-1)  # (TB, T)

    # 2-D softmax over the title axis: lane-axis max/sum, EUP reciprocal.
    m = jnp.max(scores, axis=-1, keepdims=True)             # (TB, 1)
    e = jnp.exp(scores - m)                                 # (TB, T)
    denom = jnp.sum(e, axis=-1, keepdims=True)              # (TB, 1)
    w = e * pl.reciprocal(denom, approx=True)               # (TB, T)

    conv3 = conv.reshape(TB, T, F)
    target = jnp.sum(w[:, :, None] * conv3, axis=1)         # (TB, F) f32
    out_ref[...] = target.astype(out_ref.dtype)


def news_encoder_forward(title, emb_table, conv_w, conv_b,
                         att_w, att_b, att_q, *, tb=None,
                         compute_dtype=jnp.bfloat16):
    """
    title:     (B, T)  int32 word ids
    emb_table: (V, E)  f32
    conv_w:    (F, 1, K, E)  torch Conv2d weight layout
    conv_b:    (F,)
    att_w:     (Q, F)  torch nn.Linear weight layout
    att_b:     (Q,)
    att_q:     (Q,)
    tb:        batch tile (multiple of 8); auto-sized from B when None.
    compute_dtype: MXU input dtype (default bf16; pass jnp.float32 for exact
                   parity with an f32 reference).  Accumulation is f32 always.
    returns:   (B, F)  f32
    """
    B, T = title.shape
    F, _, K, E = conv_w.shape
    Q = att_q.shape[0]
    pad = (K - 1) // 2
    Tp = T + 2 * pad

    # Embedding lookup (gather) in XLA; dropout omitted (inference mode).
    x = jnp.take(emb_table, title, axis=0)                  # (B, T, E)
    dtype = jnp.dtype(compute_dtype) if compute_dtype is not None else x.dtype

    if tb is None:
        # Big tiles amortize the ~0.35 us per-step overhead; keep grid >= 2
        # when B allows it so both v7x TensorCores get work.
        tb = max(8, min(256, 8 * pl.cdiv(pl.cdiv(B, 2), 8)))
    assert tb % 8 == 0, tb

    # Pad batch to a multiple of tb; pad word axis for the 'same' conv.
    B_pad = pl.cdiv(B, tb) * tb
    x = jnp.pad(x, ((0, B_pad - B), (pad, pad), (0, 0))).astype(dtype)

    # Pad num_filters to a lane-dense multiple of 128 with zero weights/bias:
    # padded channels stay exactly zero and are sliced off below.
    F_pad = pl.cdiv(F, 128) * 128
    # Fold the K conv taps into a single (K*E, F_pad) im2col weight slab,
    # row order (k major, e minor) matching the in-kernel concatenation.
    cw = jnp.transpose(conv_w[:, 0, :, :], (1, 2, 0)).reshape(K * E, F)
    cw = jnp.pad(cw, ((0, 0), (0, F_pad - F))).astype(dtype)
    cb = jnp.pad(conv_b, (0, F_pad - F)).reshape(1, F_pad).astype(jnp.float32)
    aw = jnp.pad(jnp.transpose(att_w),
                 ((0, F_pad - F), (0, 0))).astype(dtype)    # (F_pad, Q)
    ab = att_b.reshape(1, Q).astype(jnp.float32)
    aq = att_q.reshape(1, Q).astype(jnp.float32)

    grid = (B_pad // tb,)

    cost = pl.CostEstimate(
        flops=int(2 * B_pad * T * F_pad * (K * E + Q) + 2 * B_pad * T * F_pad),
        transcendentals=int(B_pad * T * (Q + 1)),
        bytes_accessed=int(x.size * x.dtype.itemsize
                           + cw.size * cw.dtype.itemsize
                           + aw.size * aw.dtype.itemsize
                           + B_pad * F_pad * 4),
    )

    cp_kwargs = dict(dimension_semantics=("parallel",))
    if tb > 256:
        # v5e's scoped-VMEM default is only 16 MiB; size it from the working
        # set (f32 conv activations dominate) when the tile is pushed large.
        itemsize = jnp.dtype(dtype).itemsize
        working = (tb * T * F_pad * 8                    # conv f32 (+ slack)
                   + tb * T * K * E * (itemsize + 4)     # im2col slab
                   + 4 * tb * Tp * E * itemsize          # double-buffered in
                   + 4 * tb * F_pad * 4)                 # double-buffered out
        cp_kwargs["vmem_limit_bytes"] = int(min(100 << 20,
                                                max(32 << 20, 2 * working)))

    out = pl.pallas_call(
        _news_encoder_kernel,
        out_shape=jax.ShapeDtypeStruct((B_pad, F_pad), jnp.float32),
        grid_spec=pltpu.PrefetchScalarGridSpec(
            num_scalar_prefetch=0,
            grid=grid,
            in_specs=[
                pl.BlockSpec((tb, Tp, E), lambda b: (b, 0, 0)),   # title slab
                pl.BlockSpec((K * E, F_pad), lambda b: (0, 0)),   # conv W (resident)
                pl.BlockSpec((1, F_pad), lambda b: (0, 0)),       # conv bias
                pl.BlockSpec((F_pad, Q), lambda b: (0, 0)),       # attn W
                pl.BlockSpec((1, Q), lambda b: (0, 0)),           # attn bias
                pl.BlockSpec((1, Q), lambda b: (0, 0)),           # attn query
            ],
            out_specs=pl.BlockSpec((tb, F_pad), lambda b: (b, 0)),
        ),
        compiler_params=pltpu.CompilerParams(**cp_kwargs),
        cost_estimate=cost,
    )(x, cw, cb, aw, ab, aq)

    return out[:B, :F]


def news_encoder_ref(title, emb_table, conv_w, conv_b, att_w, att_b, att_q):
    """Pure-JAX reference mirroring the PyTorch forward (inference mode)."""
    F, _, K, E = conv_w.shape
    pad = (K - 1) // 2
    x = emb_table[title]                                    # (B, T, E)
    y = lax.conv_general_dilated(
        x[:, None, :, :],                                   # (B, 1, T, E)
        conv_w,                                             # (F, 1, K, E)
        window_strides=(1, 1),
        padding=((pad, pad), (0, 0)),
        dimension_numbers=("NCHW", "OIHW", "NCHW"),
        precision=lax.Precision.HIGHEST)                    # (B, F, T, 1)
    y = jnp.maximum(y[..., 0] + conv_b[None, :, None], 0.0) # (B, F, T)
    cand = jnp.transpose(y, (0, 2, 1))                      # (B, T, F)
    temp = jnp.tanh(jnp.einsum("btf,qf->btq", cand, att_w,
                               precision=lax.Precision.HIGHEST) + att_b)
    scores = jnp.einsum("btq,q->bt", temp, att_q,
                        precision=lax.Precision.HIGHEST)
    wts = jax.nn.softmax(scores, axis=1)
    return jnp.einsum("bt,btf->bf", wts, cand,
                      precision=lax.Precision.HIGHEST)


if __name__ == "__main__":
    # Small shapes consistent with the module.
    B, T = 12, 16            # batch, num_words_title (B not a multiple of tb)
    vocab, E = 64, 32        # vocab_size, embedding_dim
    K, F, Q = 3, 48, 16      # kernel_size, num_filters, query_vector_dim

    key = jax.random.PRNGKey(0)
    k1, k2, k3, k4, k5, k6, k7 = jax.random.split(key, 7)

    title = jax.random.randint(k1, (B, T), 0, vocab, dtype=jnp.int32)
    emb_table = jax.random.normal(k2, (vocab, E), dtype=jnp.float32)
    emb_table = emb_table.at[0].set(0.0)                    # padding_idx=0

    bc = 1.0 / math.sqrt(K * E)
    conv_w = jax.random.uniform(k3, (F, 1, K, E), minval=-bc, maxval=bc,
                                dtype=jnp.float32)
    conv_b = jax.random.uniform(k4, (F,), minval=-bc, maxval=bc,
                                dtype=jnp.float32)
    ba = 1.0 / math.sqrt(F)
    att_w = jax.random.uniform(k5, (Q, F), minval=-ba, maxval=ba,
                               dtype=jnp.float32)
    att_b = jax.random.uniform(k6, (Q,), minval=-ba, maxval=ba,
                               dtype=jnp.float32)
    att_q = jax.random.uniform(k7, (Q,), minval=-0.1, maxval=0.1,
                               dtype=jnp.float32)

    ref = news_encoder_ref(title, emb_table, conv_w, conv_b,
                           att_w, att_b, att_q)

    # f32 path: near-exact parity (approx-reciprocal softmax => 2e-3 tol).
    out_f32 = news_encoder_forward(title, emb_table, conv_w, conv_b,
                                   att_w, att_b, att_q,
                                   compute_dtype=jnp.float32)
    out_f32 = jax.block_until_ready(out_f32)
    assert out_f32.shape == (B, F), out_f32.shape
    assert jnp.allclose(out_f32, ref, atol=2e-3, rtol=2e-3), (
        float(jnp.max(jnp.abs(out_f32 - ref))))

    # Default bf16 path (the HBM-bound production setting): looser tolerance.
    out_bf16 = news_encoder_forward(title, emb_table, conv_w, conv_b,
                                    att_w, att_b, att_q)
    out_bf16 = jax.block_until_ready(out_bf16)
    assert out_bf16.shape == (B, F), out_bf16.shape
    assert jnp.allclose(out_bf16, ref, atol=6e-2, rtol=6e-2), (
        float(jnp.max(jnp.abs(out_bf16 - ref))))

    print("KERNEL_OK")
</pallas_src>

<mosaic_0001>
module attributes {stable_mosaic.version = 11 : i64} {
  func.func @_news_encoder_kernel(%arg0: i32, %arg1: memref<8x18x32xf32, #tpu.memory_space<vmem>>, %arg2: memref<96x128xf32, #tpu.memory_space<vmem>>, %arg3: memref<1x128xf32, #tpu.memory_space<vmem>>, %arg4: memref<128x16xf32, #tpu.memory_space<vmem>>, %arg5: memref<1x16xf32, #tpu.memory_space<vmem>>, %arg6: memref<1x16xf32, #tpu.memory_space<vmem>>, %arg7: memref<8x128xf32, #tpu.memory_space<vmem>>) attributes {dimension_semantics = [#tpu.dimension_semantics<parallel>], iteration_bounds = array<i64: 2>, scalar_prefetch = 0 : i64, scratch_operands = 0 : i64, tpu.core_type = #tpu.core_type<tc>, window_params = [{transform_indices = @transform_0, window_bounds = array<i64: 8, 18, 32>}, {pipeline_mode = #tpu.pipeline_mode<synchronous>, transform_indices = @transform_1, window_bounds = array<i64: 96, 128>}, {pipeline_mode = #tpu.pipeline_mode<synchronous>, transform_indices = @transform_2, window_bounds = array<i64: 1, 128>}, {pipeline_mode = #tpu.pipeline_mode<synchronous>, transform_indices = @transform_3, window_bounds = array<i64: 128, 16>}, {pipeline_mode = #tpu.pipeline_mode<synchronous>, transform_indices = @transform_4, window_bounds = array<i64: 1, 16>}, {pipeline_mode = #tpu.pipeline_mode<synchronous>, transform_indices = @transform_5, window_bounds = array<i64: 1, 16>}, {transform_indices = @transform_6, window_bounds = array<i64: 8, 128>}]} {
    %c0 = arith.constant 0 : index
    %c0_0 = arith.constant 0 : index
    %c0_1 = arith.constant 0 : index
    %0 = vector.load %arg1[%c0, %c0_0, %c0_1] : memref<8x18x32xf32, #tpu.memory_space<vmem>>, vector<8x18x32xf32>
    %1 = vector.extract_strided_slice %0 {offsets = [0, 0, 0], sizes = [8, 16, 32], strides = [1, 1, 1]} : vector<8x18x32xf32> to vector<8x16x32xf32>
    %2 = vector.extract_strided_slice %0 {offsets = [0, 1, 0], sizes = [8, 16, 32], strides = [1, 1, 1]} : vector<8x18x32xf32> to vector<8x16x32xf32>
    %3 = vector.extract_strided_slice %0 {offsets = [0, 2, 0], sizes = [8, 16, 32], strides = [1, 1, 1]} : vector<8x18x32xf32> to vector<8x16x32xf32>
    %4 = tpu.concatenate %1, %2, %3 in 2 : vector<8x16x32xf32>, vector<8x16x32xf32>, vector<8x16x32xf32> -> vector<8x16x96xf32>
    %5 = vector.shape_cast %4 : vector<8x16x96xf32> to vector<128x96xf32>
    %c0_2 = arith.constant 0 : index
    %c0_3 = arith.constant 0 : index
    %6 = vector.load %arg2[%c0_2, %c0_3] : memref<96x128xf32, #tpu.memory_space<vmem>>, vector<96x128xf32>
    %cst = arith.constant dense<0.000000e+00> : vector<128x128xf32>
    %7 = tpu.matmul %5, %6, %cst {dimension_numbers = #tpu.dot_dimension_numbers<[1], [0], [0], [1], [0, 0, 1, 1], [], []>} : vector<128x96xf32>, vector<96x128xf32>, vector<128x128xf32> -> vector<128x128xf32>
    %c0_4 = arith.constant 0 : index
    %c0_5 = arith.constant 0 : index
    %8 = vector.load %arg3[%c0_4, %c0_5] : memref<1x128xf32, #tpu.memory_space<vmem>>, vector<1x128xf32>
    %9 = vector.broadcast %8 : vector<1x128xf32> to vector<128x128xf32>
    %10 = arith.addf %7, %9 : vector<128x128xf32>
    %cst_6 = arith.constant 0.000000e+00 : f32
    %11 = vector.broadcast %cst_6 : f32 to vector<128x128xf32>
    %12 = arith.maximumf %10, %11 : vector<128x128xf32>
    %c0_7 = arith.constant 0 : index
    %c0_8 = arith.constant 0 : index
    %13 = vector.load %arg4[%c0_7, %c0_8] : memref<128x16xf32, #tpu.memory_space<vmem>>, vector<128x16xf32>
    %cst_9 = arith.constant dense<0.000000e+00> : vector<128x16xf32>
    %14 = tpu.matmul %12, %13, %cst_9 {dimension_numbers = #tpu.dot_dimension_numbers<[1], [0], [0], [1], [0, 0, 1, 1], [], []>} : vector<128x128xf32>, vector<128x16xf32>, vector<128x16xf32> -> vector<128x16xf32>
    %c0_10 = arith.constant 0 : index
    %c0_11 = arith.constant 0 : index
    %15 = vector.load %arg5[%c0_10, %c0_11] : memref<1x16xf32, #tpu.memory_space<vmem>>, vector<1x16xf32>
    %16 = vector.broadcast %15 : vector<1x16xf32> to vector<128x16xf32>
    %17 = arith.addf %14, %16 : vector<128x16xf32>
    %18 = math.tanh %17 : vector<128x16xf32>
    %19 = vector.shape_cast %18 : vector<128x16xf32> to vector<8x16x16xf32>
    %c0_12 = arith.constant 0 : index
    %c0_13 = arith.constant 0 : index
    %20 = vector.load %arg6[%c0_12, %c0_13] : memref<1x16xf32, #tpu.memory_space<vmem>>, vector<1x16xf32>
    %21 = vector.shape_cast %20 : vector<1x16xf32> to vector<1x1x16xf32>
    %22 = vector.broadcast %21 : vector<1x1x16xf32> to vector<8x16x16xf32>
    %23 = arith.mulf %19, %22 : vector<8x16x16xf32>
    %cst_14 = arith.constant dense<0.000000e+00> : vector<8x16xf32>
    %24 = vector.multi_reduction <add>, %23, %cst_14 [2] : vector<8x16x16xf32> to vector<8x16xf32>
    %cst_15 = arith.constant dense<0xFF800000> : vector<8xf32>
    %25 = vector.multi_reduction <maximumf>, %24, %cst_15 [1] : vector<8x16xf32> to vector<8xf32>
    %26 = vector.shape_cast %25 : vector<8xf32> to vector<8x1xf32>
    %27 = vector.broadcast %26 : vector<8x1xf32> to vector<8x16xf32>
    %28 = arith.subf %24, %27 : vector<8x16xf32>
    %29 = math.exp %28 : vector<8x16xf32>
    %cst_16 = arith.constant dense<0.000000e+00> : vector<8xf32>
    %30 = vector.multi_reduction <add>, %29, %cst_16 [1] : vector<8x16xf32> to vector<8xf32>
    %31 = vector.shape_cast %30 : vector<8xf32> to vector<8x1xf32>
    %32 = tpu.reciprocal %31 {approx = true} : vector<8x1xf32> -> vector<8x1xf32>
    %33 = vector.broadcast %32 : vector<8x1xf32> to vector<8x16xf32>
    %34 = arith.mulf %29, %33 : vector<8x16xf32>
    %35 = vector.shape_cast %12 : vector<128x128xf32> to vector<8x16x128xf32>
    %36 = vector.shape_cast %34 : vector<8x16xf32> to vector<8x16x1xf32>
    %37 = vector.broadcast %36 : vector<8x16x1xf32> to vector<8x16x128xf32>
    %38 = arith.mulf %37, %35 : vector<8x16x128xf32>
    %cst_17 = arith.constant dense<0.000000e+00> : vector<8x128xf32>
    %39 = vector.multi_reduction <add>, %38, %cst_17 [1] : vector<8x16x128xf32> to vector<8x128xf32>
    %c0_18 = arith.constant 0 : index
    %c0_19 = arith.constant 0 : index
    %40 = vector.load %arg7[%c0_18, %c0_19] : memref<8x128xf32, #tpu.memory_space<vmem>>, vector<8x128xf32>
    tpu.vector_store %arg7[%c0_18, %c0_19], %39 {strides = array<i32>} : memref<8x128xf32, #tpu.memory_space<vmem>>, vector<8x128xf32>,
    return
  }
  func.func @transform_0(%arg0: i32) -> (i32, i32, i32) {
    %c0_i32 = arith.constant 0 : i32
    %c0_i32_0 = arith.constant 0 : i32
    %c0_i32_1 = arith.constant 0 : i32
    return %arg0, %c0_i32, %c0_i32_0 : i32, i32, i32
  }
  func.func @transform_1(%arg0: i32) -> (i32, i32) {
    %c0_i32 = arith.constant 0 : i32
    %c0_i32_0 = arith.constant 0 : i32
    %c0_i32_1 = arith.constant 0 : i32
    return %c0_i32, %c0_i32_0 : i32, i32
  }
  func.func @transform_2(%arg0: i32) -> (i32, i32) {
    %c0_i32 = arith.constant 0 : i32
    %c0_i32_0 = arith.constant 0 : i32
    %c0_i32_1 = arith.constant 0 : i32
    return %c0_i32, %c0_i32_0 : i32, i32
  }
  func.func @transform_3(%arg0: i32) -> (i32, i32) {
    %c0_i32 = arith.constant 0 : i32
    %c0_i32_0 = arith.constant 0 : i32
    %c0_i32_1 = arith.constant 0 : i32
    return %c0_i32, %c0_i32_0 : i32, i32
  }
  func.func @transform_4(%arg0: i32) -> (i32, i32) {
    %c0_i32 = arith.constant 0 : i32
    %c0_i32_0 = arith.constant 0 : i32
    %c0_i32_1 = arith.constant 0 : i32
    return %c0_i32, %c0_i32_0 : i32, i32
  }
  func.func @transform_5(%arg0: i32) -> (i32, i32) {
    %c0_i32 = arith.constant 0 : i32
    %c0_i32_0 = arith.constant 0 : i32
    %c0_i32_1 = arith.constant 0 : i32
    return %c0_i32, %c0_i32_0 : i32, i32
  }
  func.func @transform_6(%arg0: i32) -> (i32, i32) {
    %c0_i32 = arith.constant 0 : i32
    %c0_i32_0 = arith.constant 0 : i32
    return %arg0, %c0_i32 : i32, i32
  }
}

</mosaic_0001>

<bundles_post_ra>
// kernel: tpu_custom_call.1
= control target key start
LH: loop header
LB: loop body
LE: loop exit
PB: predicated region body
PF: predicated region fallthrough
CT: control target
= control target key end

     0   :  { %11 = vsyncpa [#allocation3], 0  ;;  %s2922_s0 = inlined_call_operand.vmem [shape: f32[16,18,32], index: 0, kind: input, shape index: {}]   ;;  %s2923_s1 = inlined_call_operand.vmem [shape: f32[96,128], index: 1, kind: input, shape index: {}]   ;;  %s2924_s2 = inlined_call_operand.vmem [shape: f32[1,128], index: 2, kind: input, shape index: {}]   ;;  %s2925_s3 = inlined_call_operand.vmem [shape: f32[128,16], index: 3, kind: input, shape index: {}]   ;;  %s2926_s4 = inlined_call_operand.vmem [shape: f32[1,16], index: 4, kind: input, shape index: {}]   ;;  %s2927_s5 = inlined_call_operand.vmem [shape: f32[1,16], index: 5, kind: input, shape index: {}]   ;;  %s2928_s6 = inlined_call_operand.hbm [shape: f32[16,128], index: 6, kind: output, shape index: {}]  }
   0x1   :  { %13 = vsyncpa [#allocation3 + $0x1], 0  ;;  %s2084_s21 = smov 0   ;;  %s2086_s22 = smov 0  }
   0x2   :  { %s2088_s23 = smov 0   ;;  %s2090_s24 = smov 0  }
   0x3 LB: > { %s2105_s25 = sadd.s32 4294967295, %s2043_s24   ;;  %s1646_s26 = sadd.s32 4294967294, %s2043_s24   ;;  %s2043_s24 = sphi %s2090_s24, %s2972_s24   ;;  %s2039_s23 = sphi %s2088_s23, %s2971_s23   ;;  %s2035_s22 = sphi %s2086_s22, %s2970_s22   ;;  %s2031_s21 = sphi %s2084_s21, %s2969_s21  }
   0x4   : > { %s2109_s27 = sadd.s32 1, %s2043_s24   ;;  %s157_s28 = sadd.s32 1, %s2039_s23 }
   0x5   : > { %s154_s29 = ssub.s32 %s2043_s24, %s2109_s27  ;;  %p167_p0 = scmp.ne.s32.totalorder %s2039_s23, %s2035_s22 }
   0x6   : > { %p155_p1 = scmp.eq.s32.totalorder %s154_s29, 0  ;;  %p168_p2 = scmp.eq.s32.totalorder %s2105_s25, 1 }
   0x7   : > { %p173_p3 = scmp.ne.s32.totalorder %s2035_s22, %s2031_s21  ;;  %p174_p4 = scmp.eq.s32.totalorder %s1646_s26, 1 }
   0x8   : > { %s2120_s30 = scalar_select %p155_p1, %s2039_s23, %s157_s28  }
   0x9   : > { %p2122_p5 = por %p168_p2, %p167_p0  ;;  %p2126_p6 = por %p174_p4, %p173_p3 }
   0xa   : > { %p1649_p7 = scmp.ge.s32.totalorder %s2043_s24, 1  ;;  %p217_p8 = scmp.lt.s32.totalorder %s2043_s24, 3 }
   0xc   : > { %p218_p9 = pnand %p1649_p7, %p217_p8 }
   0xd   : > { %s1651_s9 = sshll.u32 (!%p218_p9), %s2105_s25, 3  ;;  %s2045_s13 = smov (!%p218_p9), 64  }
   0xe   : > { %221 = sbr.rel (%p218_p9) target bundleno = 1452 (0x5ac), region = 44  ;;  %p249_p10 = scmp.lt.s32.totalorder (!%p218_p9), %s1651_s9, 15 }
   0xf   : > { %s2046_s14 = smov (!%p218_p9), 32   ;;  %s245_s20 = sand.u32 (!%p218_p9), 1, %s2035_s22  }
  0x10   : > { %s1650_s26 = sshll.u32 (!%p218_p9), %s245_s20, 3 }
  0x11   : > { %s247_s28 = scalar_lea.vmem (!%p218_p9), [#allocation2], %s1650_s26 }
  0x12   : > { %s1587_s10 = sshll.u32 (!%p218_p9), %s247_s28, 4  ;;  %s1588_s10 = int_to_ptr.vmem [resolvable:$true] %s1587_s10 }
  0x13   : > { %v526_v0 = vld [vmem:[%s2923_s1 + $0x58] sm:$0xff]  ;;  %v525_v1 = vld [vmem:[%s2923_s1 + $0x50] sm:$0xff]  ;;  %v524_v2 = vld [vmem:[%s2923_s1 + $0x48] sm:$0xff]  ;;  %s2974_s9 = smov (!%p249_p10, %s1651_s9), 15  ;;  %vm392_vm0 = vcmask 1045504   ;;  %vm303_vm1 = vcmask 1046528  }
  0x14   : > { %1736 = vmatprep.subr.mxu0 %v526_v0  ;;  %v523_v3 = vld [vmem:[%s2923_s1 + $0x40] sm:$0xff]  ;;  %s1872_s18 = smul.u32 24, %s2974_s9  ;;  %v522_v4 = vld [vmem:[%s2923_s1 + $0x38] sm:$0xff]  ;;  %v521_v5 = vld [vmem:[%s2923_s1 + $0x30] sm:$0xff]  ;;  %vm481_vm2 = vcmask 261120   ;;  %vm498_vm3 = vcmask 523264  }
  0x15   : > { %1737 = vmatpush3.msra.mxu0 %v526_v0  ;;  %v520_v20 = vld [vmem:[%s2923_s1 + $0x28] sm:$0xff]  ;;  %v519_v26 = vld [vmem:[%s2923_s1 + $0x20] sm:$0xff]  ;;  %v518_v28 = vld [vmem:[%s2923_s1 + $0x18] sm:$0xff]  ;;  %vm534_vm4 = vcmask 785408   ;;  %vm951_vm5 = vcmask 130048   ;;  %vm1027_vm6 = vcmask 130112  }
  0x16   : > { %1738 = vmatprep.subr.mxu0 %v525_v1  ;;  %s2151_s29 = scalar_lea.vmem %s2922_s0, %s1872_s18  ;;  %v517_v36 = vld [vmem:[%s2923_s1 + $0x10] sm:$0xff]  ;;  %v516_v42 = vld [vmem:[%s2923_s1 + $0x8] sm:$0xff]  ;;  %v515_v44 = vld [vmem:[%s2923_s1] sm:$0xff]  ;;  %vm1092_vm7 = vcmask 1041409   ;;  %vm1094_vm8 = vcmask 1042434   ;;  %vm1096_vm9 = vcmask 1043459  }
  0x17   : > { %1739 = vmatpush3.msra.mxu0 %v525_v1  ;;  %v2157_v6 = vld [vmem:[%s2151_s29] sm:$0xff]  ;;  %v2160_v7 = vld [vmem:[%s2151_s29 + $0x8] sm:$0xff]  ;;  %v257_v8 = vld [vmem:[%s2151_s29 + $0x10] sm:$0x3]  ;;  %vm1098_vm10 = vcmask 1044484   ;;  %vm1100_vm11 = vcmask 1045509  }
  0x18   : > { %1740 = vmatprep.subr.mxu0 %v524_v2  ;;  %v393_v9 = vrot.slane %v2157_v6, 2  ;;  %v394_v10 = vrot.slane %v2160_v7, 2  ;;  %v304_v11 = vrot.slane %v2157_v6, 1  ;;  %v305_v12 = vrot.slane %v2160_v7, 1  ;;  %v2168_v13 = vld [vmem:[%s2151_s29 + $0x20] sm:$0xff]  ;;  %v2172_v17 = vld [vmem:[%s2151_s29 + $0x18] sm:$0xff] }
  0x19   : > { %1741 = vmatpush3.msra.mxu0 %v524_v2  ;;  %v396_v14 = vrot.slane %v257_v8, 2  ;;  %v307_v15 = vrot.slane %v257_v8, 1  ;;  %v260_v16 = vld [vmem:[%s2151_s29 + $0x28] sm:$0x3]  ;;  %v310_v21 = vrot.slane %v2168_v13, 1  ;;  %v309_v25 = vrot.slane %v2172_v17, 1 }
  0x1a   : > { %1742 = vmatprep.subr.mxu0 %v523_v3  ;;  %v395_v18 = vsel %vm392_vm0, %v393_v9, %v394_v10  ;;  %v306_v19 = vsel %vm303_vm1, %v304_v11, %v305_v12  ;;  %v312_v24 = vrot.slane %v260_v16, 1  ;;  %v399_v27 = vrot.slane %v2168_v13, 2  ;;  %v2198_v33 = vld [vmem:[%s2151_s29 + $0x38] sm:$0xff]  ;;  %v263_v34 = vld [vmem:[%s2151_s29 + $0x40] sm:$0x3]  ;;  %v2202_v35 = vld [vmem:[%s2151_s29 + $0x30] sm:$0xff] }
  0x1b   : > { %1743 = vmatpush3.msra.mxu0 %v523_v3  ;;  %433 = vrot.lane.b32.xlu1 %v395_v18, %s2045_s13  ;;  %v397_v22 = vsel %vm392_vm0, %v394_v10, %v396_v14  ;;  %v308_v23 = vsel %vm303_vm1, %v305_v12, %v307_v15  ;;  %v311_v30 = vsel %vm303_vm1, %v309_v25, %v310_v21  ;;  %v401_v31 = vrot.slane %v260_v16, 2  ;;  %v2226_v49 = vld [vmem:[%s2151_s29 + $0x50] sm:$0xff]  ;;  %v266_v50 = vld [vmem:[%s2151_s29 + $0x58] sm:$0x3]  ;;  %v2230_v51 = vld [vmem:[%s2151_s29 + $0x48] sm:$0xff] }
  0x1c   : > { %1744 = vmatprep.subr.mxu0 %v522_v4  ;;  %344 = vrot.lane.b32.xlu0 %v306_v19, %s2046_s14  ;;  %v313_v29 = vsel %vm303_vm1, %v310_v21, %v312_v24  ;;  %v398_v32 = vrot.slane %v2172_v17, 2  ;;  %v315_v37 = vrot.slane %v2198_v33, 1  ;;  %v317_v40 = vrot.slane %v263_v34, 1  ;;  %v2245_v62 = vld [vmem:[%s2151_s29 + $0x68] sm:$0xff]  ;;  %v269_v63 = vld [vmem:[%s2151_s29 + $0x70] sm:$0x3] }
  0x1d   : > { %1745 = vmatpush3.msra.mxu0 %v522_v4  ;;  %v402_v38 = vsel %vm392_vm0, %v399_v27, %v401_v31  ;;  %v314_v41 = vrot.slane %v2202_v35, 1  ;;  %v404_v43 = vrot.slane %v2198_v33, 2  ;;  %v406_v47 = vrot.slane %v263_v34, 2  ;;  %v2249_v0 = vld [vmem:[%s2151_s29 + $0x60] sm:$0xff]  ;;  %v272_v15 = vld [vmem:[%s2151_s29 + $0x88] sm:$0x3] }
  0x1e   : > { %1746 = vmatprep.subr.mxu0 %v521_v5  ;;  %v400_v39 = vsel %vm392_vm0, %v398_v32, %v399_v27  ;;  %v318_v45 = vsel %vm303_vm1, %v315_v37, %v317_v40  ;;  %v403_v48 = vrot.slane %v2202_v35, 2  ;;  %v320_v52 = vrot.slane %v2226_v49, 1  ;;  %v2264_v14 = vld [vmem:[%s2151_s29 + $0x80] sm:$0xff]  ;;  %v2268_v16 = vld [vmem:[%s2151_s29 + $0x78] sm:$0xff] }
  0x1f   : > { %1747 = vmatpush3.msra.mxu0 %v521_v5  ;;  %435 = vrot.lane.b32.xlu1 %v397_v22, %s2045_s13  ;;  %v316_v46 = vsel %vm303_vm1, %v314_v41, %v315_v37  ;;  %v407_v53 = vsel %vm392_vm0, %v404_v43, %v406_v47  ;;  %v322_v55 = vrot.slane %v266_v50, 1  ;;  %v319_v56 = vrot.slane %v2230_v51, 1 }
  0x20   : > { %1748 = vmatprep.subr.mxu0 %v520_v20  ;;  %346 = vrot.lane.b32.xlu0 %v308_v23, %s2046_s14  ;;  %v405_v54 = vsel %vm392_vm0, %v403_v48, %v404_v43  ;;  %v409_v57 = vrot.slane %v2226_v49, 2  ;;  %v411_v60 = vrot.slane %v266_v50, 2  ;;  %v408_v61 = vrot.slane %v2230_v51, 2  ;;  %v2302_v43 = vld [vmem:[%s2151_s29 + $0xb0] sm:$0xff] }
  0x21   : > { %1749 = vmatpush3.msra.mxu0 %v520_v20  ;;  %v323_v58 = vsel %vm303_vm1, %v320_v52, %v322_v55  ;;  %v321_v59 = vsel %vm303_vm1, %v319_v56, %v320_v52  ;;  %v325_v1 = vrot.slane %v2245_v62, 1  ;;  %v327_v4 = vrot.slane %v269_v63, 1  ;;  %v758_v55 = vld [vmem:[%s2925_s3 + $0x70] sm:$0xff] }
  0x22   : > { %1750 = vmatprep.subr.mxu0 %v519_v26  ;;  %v412_v2 = vsel %vm392_vm0, %v409_v57, %v411_v60  ;;  %v410_v3 = vsel %vm392_vm0, %v408_v61, %v409_v57  ;;  %v324_v5 = vrot.slane %v2249_v0, 1  ;;  %v414_v8 = vrot.slane %v2245_v62, 2  ;;  %v757_v60 = vld [vmem:[%s2925_s3 + $0x68] sm:$0xff] }
  0x23   : > { %1751 = vmatpush3.msra.mxu0 %v519_v26  ;;  %350 = vrot.lane.b32.xlu1 %v313_v29, %s2046_s14  ;;  %v328_v9 = vsel %vm303_vm1, %v325_v1, %v327_v4  ;;  %v416_v11 = vrot.slane %v269_v63, 2  ;;  %v413_v12 = vrot.slane %v2249_v0, 2  ;;  %v330_v18 = vrot.slane %v2264_v14, 1  ;;  %v275_v29 = vld [vmem:[%s2151_s29 + $0xa0] sm:$0x3]  ;;  %v753_v4 = vld [vmem:[%s2925_s3 + $0x48] sm:$0xff] }
  0x24   : > { %1752 = vmatprep.subr.mxu0 %v518_v28  ;;  %348 = vrot.lane.b32.xlu0 %v311_v30, %s2046_s14  ;;  %v326_v10 = vsel %vm303_vm1, %v324_v5, %v325_v1  ;;  %v332_v21 = vrot.slane %v272_v15, 1  ;;  %v329_v22 = vrot.slane %v2268_v16, 1  ;;  %v419_v23 = vrot.slane %v2264_v14, 2  ;;  %v2287_v30 = vld [vmem:[%s2151_s29 + $0x90] sm:$0xff]  ;;  %v756_v1 = vld [vmem:[%s2925_s3 + $0x60] sm:$0xff] }
  0x25   : > { %1753 = vmatpush3.msra.mxu0 %v518_v28  ;;  %v417_v19 = vsel %vm392_vm0, %v414_v8, %v416_v11  ;;  %v415_v20 = vsel %vm392_vm0, %v413_v12, %v414_v8  ;;  %v421_v26 = vrot.slane %v272_v15, 2  ;;  %v418_v27 = vrot.slane %v2268_v16, 2  ;;  %v2283_v28 = vld [vmem:[%s2151_s29 + $0x98] sm:$0xff]  ;;  %v752_v5 = vld [vmem:[%s2925_s3 + $0x40] sm:$0xff] }
  0x26   : > { %1754 = vmatprep.subr.mxu0 %v517_v36  ;;  %v333_v24 = vsel %vm303_vm1, %v330_v18, %v332_v21  ;;  %v331_v25 = vsel %vm303_vm1, %v329_v22, %v330_v18  ;;  %v335_v31 = vrot.slane %v2283_v28, 1  ;;  %v334_v37 = vrot.slane %v2287_v30, 1  ;;  %v2358_v8 = vld [vmem:[%s2925_s3 + $0x38] sm:$0xff]  ;;  %v2374_v11 = vld [vmem:[%s2925_s3 + $0x20] sm:$0xff] }
  0x27   : > { %1755 = vmatpush3.msra.mxu0 %v517_v36  ;;  %439 = vrot.lane.b32.xlu1 %v402_v38, %s2045_s13  ;;  %v422_v32 = vsel %vm392_vm0, %v419_v23, %v421_v26  ;;  %v420_v34 = vsel %vm392_vm0, %v418_v27, %v419_v23  ;;  %v337_v36 = vrot.slane %v275_v29, 1  ;;  %v424_v38 = vrot.slane %v2283_v28, 2 }
  0x28   : > { %437 = vrot.lane.b32.xlu0 %v400_v39, %s2045_s13  ;;  %1756 = vmatprep.subr.mxu0 %v516_v42  ;;  %v336_v40 = vsel %vm303_vm1, %v334_v37, %v335_v31  ;;  %v426_v41 = vrot.slane %v275_v29, 2  ;;  %vm1102_vm12 = vcmask 1046534   ;;  %vm1104_vm13 = vcmask 1047559  }
  0x29   : > { %1757 = vmatpush3.msra.mxu0 %v516_v42  ;;  %v338_v39 = vsel %vm303_vm1, %v335_v31, %v337_v36  ;;  %v423_v42 = vrot.slane %v2287_v30, 2 }
  0x2a   : > { %1758 = vmatprep.subr.mxu0 %v515_v44  ;;  %v427_v47 = vsel %vm392_vm0, %v424_v38, %v426_v41 }
  0x2b   : > { %354 = vrot.lane.b32.xlu1 %v318_v45, %s2046_s14  ;;  %1759 = vmatpush3.msra.mxu0 %v515_v44  ;;  %v278_v44 = vld [vmem:[%s2151_s29 + $0xb8] sm:$0x3]  ;;  %v2306_v45 = vld [vmem:[%s2151_s29 + $0xa8] sm:$0xff]  ;;  %v425_v48 = vsel %vm392_vm0, %v423_v42, %v424_v38  ;;  %s2048_s29 = smov [#allocation2]  }
  0x2c   : > { %352 = vrot.lane.b32.xlu0 %v316_v46, %s2046_s14  ;;  %v340_v46 = vrot.slane %v2302_v43, 1  ;;  %v342_v50 = vrot.slane %v278_v44, 1  ;;  %v339_v52 = vrot.slane %v2306_v45, 1  ;;  %s1987_s15 = sshll.u32 %s2048_s29, 4  ;;  %s1988_s15 = int_to_ptr.vmem [resolvable:$false] %s1987_s15 }
  0x2d   : > { %s1989_s16 = scalar_lea.vmem %s1988_s15, 256  ;;  %p1990_p0 = scmp.lt.s32.totalorder %s1588_s10, %s1988_s15 }
  0x2e   : > { %v343_v56 = vsel %vm303_vm1, %v340_v46, %v342_v50  ;;  %v341_v57 = vsel %vm303_vm1, %v339_v52, %v340_v46 }
  0x2f   : > { %443 = vrot.lane.b32.xlu1 %v407_v53, %s2045_s13  ;;  %v2317_v53 = vld [vmem:[%s2925_s3 + $0x78] sm:$0xff] }
  0x30   : > { %441 = vrot.lane.b32.xlu0 %v405_v54, %s2045_s13  ;;  %1784 = vmatprep.subr.mxu0 %v2317_v53  ;;  %v429_v54 = vrot.slane %v2302_v43, 2 }
  0x31   : > { %1840 = vmatprep.subr.mxu1 %v2317_v53 }
  0x32   : > { %1856 = vmatpush3.msra.mxu1 %v2317_v53 }
  0x33   : > { %358 = vrot.lane.b32.xlu1 %v323_v58, %s2046_s14  ;;  %v431_v58 = vrot.slane %v278_v44, 2  ;;  %1841 = vmatprep.subr.mxu1 %v758_v55 }
  0x34   : > { %356 = vrot.lane.b32.xlu0 %v321_v59, %s2046_s14  ;;  %v428_v59 = vrot.slane %v2306_v45, 2  ;;  %1857 = vmatpush3.msra.mxu1 %v758_v55 }
  0x35   : > { %1842 = vmatprep.subr.mxu1 %v757_v60  ;;  %v432_v61 = vsel %vm392_vm0, %v429_v54, %v431_v58 }
  0x36   : > { %v430_v63 = vsel %vm392_vm0, %v428_v59, %v429_v54  ;;  %1858 = vmatpush3.msra.mxu1 %v757_v60 }
  0x37   : > { %447 = vrot.lane.b32.xlu1 %v412_v2, %s2045_s13  ;;  %1843 = vmatprep.subr.mxu1 %v756_v1  ;;  %v755_v2 = vld [vmem:[%s2925_s3 + $0x58] sm:$0xff] }
  0x38   : > { %445 = vrot.lane.b32.xlu0 %v410_v3, %s2045_s13  ;;  %1859 = vmatpush3.msra.mxu1 %v756_v1  ;;  %v754_v3 = vld [vmem:[%s2925_s3 + $0x50] sm:$0xff] }
  0x39   : > { %1844 = vmatprep.subr.mxu1 %v755_v2 }
  0x3a   : > { %1860 = vmatpush3.msra.mxu1 %v755_v2 }
  0x3b   : > { %362 = vrot.lane.b32.xlu1 %v328_v9, %s2046_s14  ;;  %1845 = vmatprep.subr.mxu1 %v754_v3  ;;  %v750_v9 = vld [vmem:[%s2925_s3 + $0x30] sm:$0xff] }
  0x3c   : > { %360 = vrot.lane.b32.xlu0 %v326_v10, %s2046_s14  ;;  %1861 = vmatpush3.msra.mxu1 %v754_v3  ;;  %v2368_v10 = vld [vmem:[%s2925_s3 + $0x28] sm:$0xff] }
  0x3d   : > { %1846 = vmatprep.subr.mxu1 %v753_v4 }
  0x3e   : > { %1862 = vmatpush3.msra.mxu1 %v753_v4 }
  0x3f   : > { %451 = vrot.lane.b32.xlu1 %v417_v19, %s2045_s13  ;;  %1847 = vmatprep.subr.mxu1 %v752_v5 }
  0x40   : > { %449 = vrot.lane.b32.xlu0 %v415_v20, %s2045_s13  ;;  %1863 = vmatpush3.msra.mxu1 %v752_v5 }
  0x41   : > { %1848 = vmatprep.subr.mxu1 %v2358_v8 }
  0x42   : > { %1864 = vmatpush3.msra.mxu1 %v2358_v8 }
  0x43   : > { %366 = vrot.lane.b32.xlu1 %v333_v24, %s2046_s14  ;;  %1849 = vmatprep.subr.mxu1 %v750_v9 }
  0x44   : > { %364 = vrot.lane.b32.xlu0 %v331_v25, %s2046_s14  ;;  %1865 = vmatpush3.msra.mxu1 %v750_v9 }
  0x45   : > { %1850 = vmatprep.subr.mxu1 %v2368_v10 }
  0x46   : > { %1866 = vmatpush3.msra.mxu1 %v2368_v10 }
  0x47   : > { %455 = vrot.lane.b32.xlu1 %v422_v32, %s2045_s13  ;;  %1851 = vmatprep.subr.mxu1 %v2374_v11 }
  0x48   : > { %453 = vrot.lane.b32.xlu0 %v420_v34, %s2045_s13  ;;  %1867 = vmatpush3.msra.mxu1 %v2374_v11 }
  0x4b   : > { %370 = vrot.lane.b32.xlu1 %v338_v39, %s2046_s14 }
  0x4c   : > { %368 = vrot.lane.b32.xlu0 %v336_v40, %s2046_s14 }
  0x4f   : > { %459 = vrot.lane.b32.xlu1 %v427_v47, %s2045_s13 }
  0x50   : > { %457 = vrot.lane.b32.xlu0 %v425_v48, %s2045_s13 }
  0x53   : > { %374 = vrot.lane.b32.xlu1 %v343_v56, %s2046_s14 }
  0x54   : > { %372 = vrot.lane.b32.xlu0 %v341_v57, %s2046_s14  ;;  %s1673_s14 = sshll.u32 %s2105_s25, 7  ;;  %s1574_s25 = scalar_lea.sflag [#allocation3], %s245_s20 }
  0x55   : > { %s2884_s12 = scalar_lea.hbm %s2928_s6, %s1673_s14 }
  0x57   : > { %463 = vrot.lane.b32.xlu1 %v432_v61, %s2045_s13 }
  0x58   : > { %461 = vrot.lane.b32.xlu0 %v430_v63, %s2045_s13  ;;  %s1983_s13 = scalar_lea.vmem %s1588_s10, 128 }
  0x59   : > { %p1984_p11 = scmp.ne.s32.totalorder %s1588_s10, %s1983_s13  ;;  %p1991_p1 = scmp.lt.s32.totalorder %s1989_s16, %s1983_s13 }
  0x5b   : > { %p1985_p12 = pnand %p1984_p11, %p2122_p5  ;;  %p1992_p2 = por %p1991_p1, %p1990_p0 }
  0x5d   : > { %p1986_p13 = pneg %p1985_p12 }
  0x5f   : > { %p1993_p3 = pnand %p1992_p2, %p1986_p13 }
  0x8d   : > { %v434_v12 = vpop.permute.xlu1 %433 }
  0x8e   : > { %v345_v15 = vpop.permute.xlu0 %344 }
  0x8f   : > { %v482_v18 = vsel %vm481_vm2, %v2157_v6, %v345_v15 }
  0x90   : > { %v499_v19 = vsel %vm498_vm3, %v482_v18, %v434_v12  ;;  %v747_v18 = vld [vmem:[%s2925_s3 + $0x18] sm:$0xff] }
  0x91   : > { %1760 = vmatprep.mubr.msk.f32.mxu0 %vm534_vm4, %v499_v19  ;;  %v436_v20 = vpop.permute.xlu1 %435  ;;  %1852 = vmatprep.subr.mxu1 %v747_v18  ;;  %v744_v19 = vld [vmem:[%s2925_s3] sm:$0xff] }
  0x92   : > { %v347_v21 = vpop.permute.xlu0 %346  ;;  %1868 = vmatpush3.msra.mxu1 %v747_v18 }
  0x93   : > { %v483_v22 = vsel %vm481_vm2, %v2160_v7, %v347_v21 }
  0x94   : > { %v500_v23 = vsel %vm498_vm3, %v483_v22, %v436_v20  ;;  %v1653_v20 = vld [vmem:[%s2924_s2] ss:$0 sm:$0xff] }
  0x95   : > { %1761 = vmatmul.mubr.msk.f32.vlgmr.msra.gmra.mxu0 %vm534_vm4, %v500_v23  ;;  %v351_v24 = vpop.permute.xlu1 %350 }
  0x96   : > { %v349_v25 = vpop.permute.xlu0 %348  ;;  %1785 = vmatpush3.msra.mxu0 %v2317_v53  ;;  %v485_v6 = vsel %vm481_vm2, %v2168_v13, %v351_v24 }
  0x97   : > { %1786 = vmatprep.subr.mxu0 %v758_v55  ;;  %v484_v26 = vsel %vm481_vm2, %v2172_v17, %v349_v25 }
  0x98   : > { %1787 = vmatpush3.msra.mxu0 %v758_v55 }
  0x99   : > { %1788 = vmatprep.subr.mxu0 %v757_v60  ;;  %v440_v27 = vpop.permute.xlu1 %439 }
  0x9a   : > { %v438_v29 = vpop.permute.xlu0 %437  ;;  %1789 = vmatpush3.msra.mxu0 %v757_v60  ;;  %v502_v7 = vsel %vm498_vm3, %v485_v6, %v440_v27 }
  0x9b   : > { %v501_v31 = vsel %vm498_vm3, %v484_v26, %v438_v29  ;;  %1790 = vmatprep.subr.mxu0 %v756_v1 }
  0x9c   : > { %1763 = vmatprep.mubr.msk.f32.mxu0 %vm534_vm4, %v501_v31  ;;  %1791 = vmatpush3.msra.mxu0 %v756_v1 }
  0x9d   : > { %1764 = vmatmul.mubr.msk.f32.gmra.mxu0 %vm534_vm4, %v502_v7  ;;  %1792 = vmatprep.subr.mxu0 %v755_v2  ;;  %v355_v32 = vpop.permute.xlu1 %354 }
  0x9e   : > { %v353_v34 = vpop.permute.xlu0 %352  ;;  %1793 = vmatpush3.msra.mxu0 %v755_v2  ;;  %v487_v13 = vsel %vm481_vm2, %v2198_v33, %v355_v32 }
  0x9f   : > { %1794 = vmatprep.subr.mxu0 %v754_v3  ;;  %v486_v17 = vsel %vm481_vm2, %v2202_v35, %v353_v34 }
  0xa0   : > { %1795 = vmatpush3.msra.mxu0 %v754_v3 }
  0xa1   : > { %1796 = vmatprep.subr.mxu0 %v753_v4  ;;  %v444_v36 = vpop.permute.xlu1 %443 }
  0xa2   : > { %v442_v37 = vpop.permute.xlu0 %441  ;;  %1797 = vmatpush3.msra.mxu0 %v753_v4  ;;  %v504_v38 = vsel %vm498_vm3, %v487_v13, %v444_v36 }
  0xa3   : > { %v503_v39 = vsel %vm498_vm3, %v486_v17, %v442_v37  ;;  %1798 = vmatprep.subr.mxu0 %v752_v5 }
  0xa4   : > { %1766 = vmatprep.mubr.msk.f32.mxu0 %vm534_vm4, %v503_v39  ;;  %1799 = vmatpush3.msra.mxu0 %v752_v5 }
  0xa5   : > { %1767 = vmatmul.mubr.msk.f32.gmra.mxu0 %vm534_vm4, %v504_v38  ;;  %1800 = vmatprep.subr.mxu0 %v2358_v8  ;;  %v359_v40 = vpop.permute.xlu1 %358 }
  0xa6   : > { %v357_v33 = vpop.permute.xlu0 %356  ;;  %1801 = vmatpush3.msra.mxu0 %v2358_v8  ;;  %v489_v35 = vsel %vm481_vm2, %v2226_v49, %v359_v40 }
  0xa7   : > { %1802 = vmatprep.subr.mxu0 %v750_v9  ;;  %v488_v41 = vsel %vm481_vm2, %v2230_v51, %v357_v33 }
  0xa8   : > { %1803 = vmatpush3.msra.mxu0 %v750_v9 }
  0xa9   : > { %1804 = vmatprep.subr.mxu0 %v2368_v10  ;;  %v448_v42 = vpop.permute.xlu1 %447 }
  0xaa   : > { %v446_v44 = vpop.permute.xlu0 %445  ;;  %1805 = vmatpush3.msra.mxu0 %v2368_v10  ;;  %v506_v46 = vsel %vm498_vm3, %v489_v35, %v448_v42 }
  0xab   : > { %v505_v47 = vsel %vm498_vm3, %v488_v41, %v446_v44  ;;  %1806 = vmatprep.subr.mxu0 %v2374_v11 }
  0xac   : > { %1769 = vmatprep.mubr.msk.f32.mxu0 %vm534_vm4, %v505_v47  ;;  %1807 = vmatpush3.msra.mxu0 %v2374_v11 }
  0xad   : > { %1770 = vmatmul.mubr.msk.f32.gmra.mxu0 %vm534_vm4, %v506_v46  ;;  %v363_v49 = vpop.permute.xlu1 %362  ;;  %1808 = vmatprep.subr.mxu0 %v747_v18 }
  0xae   : > { %v361_v48 = vpop.permute.xlu0 %360  ;;  %v491_v51 = vsel %vm481_vm2, %v2245_v62, %v363_v49  ;;  %1809 = vmatpush3.msra.mxu0 %v747_v18 }
  0xaf   : > { %v490_v50 = vsel %vm481_vm2, %v2249_v0, %v361_v48 }
  0xb1   : > { %v452_v52 = vpop.permute.xlu1 %451 }
  0xb2   : > { %v450_v53 = vpop.permute.xlu0 %449  ;;  %v508_v54 = vsel %vm498_vm3, %v491_v51, %v452_v52 }
  0xb3   : > { %v507_v55 = vsel %vm498_vm3, %v490_v50, %v450_v53 }
  0xb4   : > { %1772 = vmatprep.mubr.msk.f32.mxu0 %vm534_vm4, %v507_v55 }
  0xb5   : > { %1773 = vmatmul.mubr.msk.f32.gmra.mxu0 %vm534_vm4, %v508_v54  ;;  %v367_v56 = vpop.permute.xlu1 %366 }
  0xb6   : > { %v365_v57 = vpop.permute.xlu0 %364  ;;  %v493_v58 = vsel %vm481_vm2, %v2264_v14, %v367_v56 }
  0xb7   : > { %v492_v62 = vsel %vm481_vm2, %v2268_v16, %v365_v57 }
  0xb9   : > { %v456_v59 = vpop.permute.xlu1 %455 }
  0xba   : > { %v454_v0 = vpop.permute.xlu0 %453  ;;  %v510_v60 = vsel %vm498_vm3, %v493_v58, %v456_v59 }
  0xbb   : > { %v509_v61 = vsel %vm498_vm3, %v492_v62, %v454_v0 }
  0xbc   : > { %1775 = vmatprep.mubr.msk.f32.mxu0 %vm534_vm4, %v509_v61 }
  0xbd   : > { %1776 = vmatmul.mubr.msk.f32.gmra.mxu0 %vm534_vm4, %v510_v60  ;;  %v371_v63 = vpop.permute.xlu1 %370 }
  0xbe   : > { %v369_v1 = vpop.permute.xlu0 %368  ;;  %v495_v2 = vsel %vm481_vm2, %v2283_v28, %v371_v63 }
  0xbf   : > { %v494_v14 = vsel %vm481_vm2, %v2287_v30, %v369_v1 }
  0xc1   : > { %v460_v3 = vpop.permute.xlu1 %459 }
  0xc2   : > { %v458_v16 = vpop.permute.xlu0 %457  ;;  %v512_v4 = vsel %vm498_vm3, %v495_v2, %v460_v3 }
  0xc3   : > { %v511_v5 = vsel %vm498_vm3, %v494_v14, %v458_v16  ;;  %v2548_v16 = vld [vmem:[%s2926_s4] ss:$0 sm:$0xff] }
  0xc4   : > { %1778 = vmatprep.mubr.msk.f32.mxu0 %vm534_vm4, %v511_v5 }
  0xc5   : > { %1779 = vmatmul.mubr.msk.f32.gmra.mxu0 %vm534_vm4, %v512_v4  ;;  %v375_v8 = vpop.permute.xlu1 %374 }
  0xc6   : > { %v373_v9 = vpop.permute.xlu0 %372  ;;  %v497_v10 = vsel %vm481_vm2, %v2302_v43, %v375_v8  ;;  %v746_v43 = vld [vmem:[%s2925_s3 + $0x10] sm:$0xff] }
  0xc7   : > { %v496_v28 = vsel %vm481_vm2, %v2306_v45, %v373_v9  ;;  %1810 = vmatprep.subr.mxu0 %v746_v43  ;;  %1853 = vmatprep.subr.mxu1 %v746_v43  ;;  %v745_v45 = vld [vmem:[%s2925_s3 + $0x8] sm:$0xff] }
  0xc8   : > { %1811 = vmatpush3.msra.mxu0 %v746_v43  ;;  %1869 = vmatpush3.msra.mxu1 %v746_v43 }
  0xc9   : > { %v464_v11 = vpop.permute.xlu1 %463  ;;  %1812 = vmatprep.subr.mxu0 %v745_v45  ;;  %1854 = vmatprep.subr.mxu1 %v745_v45 }
  0xca   : > { %v462_v30 = vpop.permute.xlu0 %461  ;;  %v514_v12 = vsel %vm498_vm3, %v497_v10, %v464_v11  ;;  %1813 = vmatpush3.msra.mxu0 %v745_v45  ;;  %1870 = vmatpush3.msra.mxu1 %v745_v45 }
  0xcb   : > { %v513_v15 = vsel %vm498_vm3, %v496_v28, %v462_v30  ;;  %1814 = vmatprep.subr.mxu0 %v744_v19  ;;  %1855 = vmatprep.subr.mxu1 %v744_v19 }
  0xcc   : > { %1781 = vmatprep.mubr.msk.f32.mxu0 %vm534_vm4, %v513_v15  ;;  %1815 = vmatpush3.msra.mxu0 %v744_v19 }
  0xcd   : > { %1782 = vmatmul.mubr.msk.f32.gmra.mxu0 %vm534_vm4, %v514_v12  ;;  %1871 = vmatpush3.msra.mxu1 %v744_v19  ;;  %v2557_v12 = vld [vmem:[%s2927_s5] ss:$0 sm:$0xff] }
 0x155   : > { %v1762_v21 = vpop.f32.mrf.mxu0 }
 0x156   : > { %v2465_v22 = vadd.f32 %v1762_v21, %v1653_v20 }
 0x157   : > { %v649_v23 = vpop.f32.mrf.mxu0 }
 0x158   : > { %v2467_v24 = vadd.f32 %v1653_v20, %v649_v23  ;;  %v2942_v6 = vmax.f32 %v2465_v22, 0.0 }
 0x15a   : > { %v2937_v25 = vmax.f32 %v2467_v24, 0.0 }
 0x15c   : > { %1816 = vmatprep.mubr.f32.mxu0 %v2937_v25 }
 0x15d   : > { %v1765_v26 = vpop.f32.mrf.mxu0  ;;  %1817 = vmatmul.mubr.f32.vlgmr.msra.gmra.mxu0 %v2942_v6 }
 0x15e   : > { %v2475_v27 = vadd.f32 %v1765_v26, %v1653_v20 }
 0x15f   : > { %v659_v29 = vpop.f32.mrf.mxu0 }
 0x160   : > { %v2477_v7 = vadd.f32 %v1653_v20, %v659_v29  ;;  %v2944_v32 = vmax.f32 %v2475_v27, 0.0 }
 0x162   : > { %v2941_v31 = vmax.f32 %v2477_v7, 0.0 }
 0x164   : > { %1819 = vmatprep.mubr.f32.mxu1 %v2941_v31 }
 0x165   : > { %v1768_v34 = vpop.f32.mrf.mxu0  ;;  %1820 = vmatmul.mubr.f32.vlgmr.msra.gmra.mxu1 %v2944_v32 }
 0x166   : > { %v2485_v13 = vadd.f32 %v1768_v34, %v1653_v20 }
 0x167   : > { %v669_v17 = vpop.f32.mrf.mxu0 }
 0x168   : > { %v2487_v36 = vadd.f32 %v1653_v20, %v669_v17  ;;  %v2943_v38 = vmax.f32 %v2485_v13, 0.0 }
 0x16a   : > { %v2939_v37 = vmax.f32 %v2487_v36, 0.0 }
 0x16c   : > { %1822 = vmatprep.mubr.f32.mxu1 %v2939_v37 }
 0x16d   : > { %v1771_v39 = vpop.f32.mrf.mxu0  ;;  %1823 = vmatmul.mubr.f32.gmra.mxu1 %v2943_v38 }
 0x16e   : > { %v2495_v40 = vadd.f32 %v1771_v39, %v1653_v20 }
 0x16f   : > { %v679_v33 = vpop.f32.mrf.mxu0 }
 0x170   : > { %v2497_v35 = vadd.f32 %v1653_v20, %v679_v33  ;;  %v2940_v42 = vmax.f32 %v2495_v40, 0.0 }
 0x172   : > { %v2936_v41 = vmax.f32 %v2497_v35, 0.0 }
 0x174   : > { %1825 = vmatprep.mubr.f32.mxu1 %v2936_v41 }
 0x175   : > { %v1774_v44 = vpop.f32.mrf.mxu0  ;;  %1826 = vmatmul.mubr.f32.gmra.mxu1 %v2940_v42 }
 0x176   : > { %v2505_v46 = vadd.f32 %v1774_v44, %v1653_v20 }
 0x177   : > { %v689_v47 = vpop.f32.mrf.mxu0 }
 0x178   : > { %v2507_v49 = vadd.f32 %v1653_v20, %v689_v47  ;;  %v2935_v51 = vmax.f32 %v2505_v46, 0.0 }
 0x17a   : > { %v2938_v48 = vmax.f32 %v2507_v49, 0.0 }
 0x17c   : > { %1828 = vmatprep.mubr.f32.mxu1 %v2938_v48 }
 0x17d   : > { %v1777_v50 = vpop.f32.mrf.mxu0  ;;  %1829 = vmatmul.mubr.f32.gmra.mxu1 %v2935_v51 }
 0x17e   : > { %v2515_v52 = vadd.f32 %v1777_v50, %v1653_v20 }
 0x17f   : > { %v699_v53 = vpop.f32.mrf.mxu0 }
 0x180   : > { %v2517_v54 = vadd.f32 %v1653_v20, %v699_v53  ;;  %v2933_v56 = vmax.f32 %v2515_v52, 0.0 }
 0x182   : > { %v2934_v55 = vmax.f32 %v2517_v54, 0.0 }
 0x184   : > { %1831 = vmatprep.mubr.f32.mxu1 %v2934_v55 }
 0x185   : > { %v1780_v57 = vpop.f32.mrf.mxu0  ;;  %1832 = vmatmul.mubr.f32.gmra.mxu1 %v2933_v56 }
 0x186   : > { %v2525_v58 = vadd.f32 %v1780_v57, %v1653_v20 }
 0x187   : > { %v709_v62 = vpop.f32.mrf.mxu0 }
 0x188   : > { %v2527_v59 = vadd.f32 %v1653_v20, %v709_v62  ;;  %v2931_v60 = vmax.f32 %v2525_v58, 0.0 }
 0x18a   : > { %v2932_v0 = vmax.f32 %v2527_v59, 0.0 }
 0x18c   : > { %1834 = vmatprep.mubr.f32.mxu1 %v2932_v0 }
 0x18d   : > { %v1783_v61 = vpop.f32.mrf.mxu0  ;;  %1835 = vmatmul.mubr.f32.gmra.mxu1 %v2931_v60 }
 0x18e   : > { %v2535_v63 = vadd.f32 %v1783_v61, %v1653_v20 }
 0x18f   : > { %v719_v1 = vpop.f32.mrf.mxu0 }
 0x190   : > { %v2537_v2 = vadd.f32 %v1653_v20, %v719_v1  ;;  %v2929_v3 = vmax.f32 %v2535_v63, 0.0 }
 0x192   : > { %v2930_v14 = vmax.f32 %v2537_v2, 0.0 }
 0x194   : > { %1837 = vmatprep.mubr.f32.mxu1 %v2930_v14 }
 0x195   : > { %1838 = vmatmul.mubr.f32.gmra.mxu1 %v2929_v3 }
 0x21d   : > { %v1818_v4 = vpop.f32.mrf.mxu0 }
 0x21e   : > { %v839_v5 = vadd.f32 %v1818_v4, %v2548_v16 }
 0x21f   : > { %v833_v8 = vpop.f32.mrf.mxu0 }
 0x220   : > { %1917 = vtanh.f32 %v839_v5  ;;  %v834_v9 = vadd.f32 %v2548_v16, %v833_v8 }
 0x222   : > { %1919 = vtanh.f32 %v834_v9 }
 0x225   : > { %v1821_v10 = vpop.f32.mrf.mxu1 }
 0x226   : > { %v849_v28 = vadd.f32 %v1821_v10, %v2548_v16 }
 0x227   : > { %v843_v11 = vpop.f32.mrf.mxu1 }
 0x228   : > { %1921 = vtanh.f32 %v849_v28  ;;  %v844_v30 = vadd.f32 %v2548_v16, %v843_v11 }
 0x22a   : > { %1923 = vtanh.f32 %v844_v30 }
 0x22d   : > { %v1918_v15 = vpop.eup %1917  ;;  %v1824_v18 = vpop.f32.mrf.mxu1 }
 0x22e   : > { %v859_v43 = vadd.f32 %v1824_v18, %v2548_v16  ;;  %v936_v45 = vmul.f32 %v1918_v15, %v2557_v12 }
 0x22f   : > { %v1920_v19 = vpop.eup %1919  ;;  %v853_v20 = vpop.f32.mrf.mxu1 }
 0x230   : > { %1925 = vtanh.f32 %v859_v43  ;;  %v854_v21 = vadd.f32 %v2548_v16, %v853_v20  ;;  %v955_v23 = vsel %vm951_vm5, %v936_v45, 0.0  ;;  %v935_v26 = vmul.f32 %v1920_v19, %v2557_v12 }
 0x231   : > { %956 = vadd.xlane.f32.xlu1 %v955_v23 }
 0x232   : > { %1927 = vtanh.f32 %v854_v21  ;;  %v952_v29 = vsel %vm951_vm5, %v935_v26, 0.0 }
 0x233   : > { %953 = vadd.xlane.f32.xlu0 %v952_v29 }
 0x235   : > { %v1922_v34 = vpop.eup %1921  ;;  %v1827_v17 = vpop.f32.mrf.mxu1 }
 0x236   : > { %v869_v39 = vadd.f32 %v1827_v17, %v2548_v16  ;;  %v938_v33 = vmul.f32 %v1922_v34, %v2557_v12 }
 0x237   : > { %v1924_v44 = vpop.eup %1923  ;;  %v863_v47 = vpop.f32.mrf.mxu1 }
 0x238   : > { %1929 = vtanh.f32 %v869_v39  ;;  %v864_v50 = vadd.f32 %v2548_v16, %v863_v47  ;;  %v961_v53 = vsel %vm951_vm5, %v938_v33, 0.0  ;;  %v937_v57 = vmul.f32 %v1924_v44, %v2557_v12 }
 0x239   : > { %962 = vadd.xlane.f32.xlu0 %v961_v53 }
 0x23a   : > { %1931 = vtanh.f32 %v864_v50  ;;  %v958_v62 = vsel %vm951_vm5, %v937_v57, 0.0 }
 0x23d   : > { %v1926_v61 = vpop.eup %1925  ;;  %v1830_v1 = vpop.f32.mrf.mxu1  ;;  %959 = vadd.xlane.f32.xlu0 %v958_v62 }
 0x23e   : > { %v879_v4 = vadd.f32 %v1830_v1, %v2548_v16  ;;  %v940_v5 = vmul.f32 %v1926_v61, %v2557_v12 }
 0x23f   : > { %v1928_v8 = vpop.eup %1927  ;;  %v873_v9 = vpop.f32.mrf.mxu1 }
 0x240   : > { %1933 = vtanh.f32 %v879_v4  ;;  %v874_v10 = vadd.f32 %v2548_v16, %v873_v9  ;;  %v967_v28 = vsel %vm951_vm5, %v940_v5, 0.0  ;;  %v939_v11 = vmul.f32 %v1928_v8, %v2557_v12 }
 0x241   : > { %968 = vadd.xlane.f32.xlu0 %v967_v28 }
 0x242   : > { %1935 = vtanh.f32 %v874_v10  ;;  %v964_v30 = vsel %vm951_vm5, %v939_v11, 0.0 }
 0x243   : > { %965 = vadd.xlane.f32.xlu1 %v964_v30 }
 0x245   : > { %v1930_v15 = vpop.eup %1929  ;;  %v1833_v18 = vpop.f32.mrf.mxu1 }
 0x246   : > { %v889_v43 = vadd.f32 %v1833_v18, %v2548_v16  ;;  %v942_v45 = vmul.f32 %v1930_v15, %v2557_v12 }
 0x247   : > { %v1932_v19 = vpop.eup %1931  ;;  %v883_v20 = vpop.f32.mrf.mxu1 }
 0x248   : > { %1937 = vtanh.f32 %v889_v43  ;;  %v884_v21 = vadd.f32 %v2548_v16, %v883_v20  ;;  %v973_v23 = vsel %vm951_vm5, %v942_v45, 0.0  ;;  %v941_v26 = vmul.f32 %v1932_v19, %v2557_v12 }
 0x249   : > { %974 = vadd.xlane.f32.xlu0 %v973_v23 }
 0x24a   : > { %1939 = vtanh.f32 %v884_v21  ;;  %v970_v29 = vsel %vm951_vm5, %v941_v26, 0.0 }
 0x24b   : > { %971 = vadd.xlane.f32.xlu1 %v970_v29 }
 0x24d   : > { %v1934_v34 = vpop.eup %1933  ;;  %v1836_v17 = vpop.f32.mrf.mxu1 }
 0x24e   : > { %v899_v39 = vadd.f32 %v1836_v17, %v2548_v16  ;;  %v944_v33 = vmul.f32 %v1934_v34, %v2557_v12 }
 0x24f   : > { %v1936_v44 = vpop.eup %1935  ;;  %v893_v47 = vpop.f32.mrf.mxu1 }
 0x250   : > { %1941 = vtanh.f32 %v899_v39  ;;  %v894_v50 = vadd.f32 %v2548_v16, %v893_v47  ;;  %v979_v53 = vsel %vm951_vm5, %v944_v33, 0.0  ;;  %v943_v57 = vmul.f32 %v1936_v44, %v2557_v12 }
 0x251   : > { %980 = vadd.xlane.f32.xlu0 %v979_v53  ;;  %v1016_v53 = vlaneseq }
 0x252   : > { %1943 = vtanh.f32 %v894_v50  ;;  %v976_v62 = vsel %vm951_vm5, %v943_v57, 0.0 }
 0x253   : > { %977 = vadd.xlane.f32.xlu1 %v976_v62  ;;  %v1017_v62 = vand.u32 127, %v1016_v53 }
 0x255   : > { %v1938_v61 = vpop.eup %1937  ;;  %v1839_v1 = vpop.f32.mrf.mxu1 }
 0x256   : > { %v909_v4 = vadd.f32 %v1839_v1, %v2548_v16  ;;  %v946_v5 = vmul.f32 %v1938_v61, %v2557_v12 }
 0x257   : > { %v1940_v8 = vpop.eup %1939  ;;  %v903_v9 = vpop.f32.mrf.mxu1 }
 0x258   : > { %1945 = vtanh.f32 %v909_v4  ;;  %v904_v10 = vadd.f32 %v2548_v16, %v903_v9  ;;  %v985_v28 = vsel %vm951_vm5, %v946_v5, 0.0  ;;  %v945_v11 = vmul.f32 %v1940_v8, %v2557_v12 }
 0x259   : > { %986 = vadd.xlane.f32.xlu0 %v985_v28  ;;  %v2623_v4 = vshrl.u32 %v1016_v53, 7  ;;  %v1022_v5 = vadd.s32 4294967288, %v1017_v62 }
 0x25a   : > { %1947 = vtanh.f32 %v904_v10  ;;  %v982_v30 = vsel %vm951_vm5, %v945_v11, 0.0 }
 0x25b   : > { %983 = vadd.xlane.f32.xlu1 %v982_v30  ;;  %v2626_v8 = vsub.s32 %v1017_v62, %v2623_v4  ;;  %v2633_v28 = vsub.s32 %v1022_v5, %v2623_v4  ;;  %v2947_v56 = vsub.s32 3, %v2623_v4 }
 0x25d   : > { %v1942_v15 = vpop.eup %1941 }
 0x25e   : > { %v948_v18 = vmul.f32 %v1942_v15, %v2557_v12 }
 0x25f   : > { %v1944_v43 = vpop.eup %1943 }
 0x260   : > { %v991_v45 = vsel %vm951_vm5, %v948_v18, 0.0  ;;  %v947_v19 = vmul.f32 %v1944_v43, %v2557_v12 }
 0x261   : > { %992 = vadd.xlane.f32.xlu0 %v991_v45 }
 0x262   : > { %v988_v16 = vsel %vm951_vm5, %v947_v19, 0.0 }
 0x263   : > { %989 = vadd.xlane.f32.xlu1 %v988_v16 }
 0x265   : > { %v1946_v20 = vpop.eup %1945 }
 0x266   : > { %v950_v21 = vmul.f32 %v1946_v20, %v2557_v12 }
 0x267   : > { %v1948_v23 = vpop.eup %1947 }
 0x268   : > { %v997_v26 = vsel %vm951_vm5, %v950_v21, 0.0  ;;  %v949_v29 = vmul.f32 %v1948_v23, %v2557_v12 }
 0x269   : > { %998 = vadd.xlane.f32.xlu0 %v997_v26 }
 0x26a   : > { %v994_v34 = vsel %vm951_vm5, %v949_v29, 0.0 }
 0x26b   : > { %995 = vadd.xlane.f32.xlu1 %v994_v34 }
 0x2ba   : > { %v2609_v44 = vpop.xlane.xlu1 %956 }
 0x2bb   : > { %v1026_v21 = vrot.slane %v2609_v44, %v2633_v28 }
 0x2bc   : > { %v2603_v17 = vpop.xlane.xlu0 %953 }
 0x2bd   : > { %v1021_v15 = vrot.slane %v2603_v17, %v2626_v8 }
 0x2bf   : > { %v1028_v5 = vsel %vm1027_vm6, %v1026_v21, %v1021_v15 }
 0x2c2   : > { %v2605_v39 = vpop.xlane.xlu0 %962 }
 0x2c3   : > { %v1036_v18 = vrot.slane %v2605_v39, %v2633_v28 }
 0x2c6   : > { %v2607_v33 = vpop.xlane.xlu0 %959 }
 0x2c7   : > { %v1032_v11 = vrot.slane %v2607_v33, %v2626_v8 }
 0x2c9   : > { %v1037_v23 = vsel %vm1027_vm6, %v1036_v18, %v1032_v11 }
 0x2ca   : > { %v2613_v50 = vpop.xlane.xlu0 %968  ;;  %v1093_v3 = vsel %vm1092_vm7, %v1037_v23, %v1028_v5  ;;  %v2047_v5 = vmov 0  }
 0x2cb   : > { %v1045_v19 = vrot.slane %v2613_v50, %v2633_v28  ;;  %1916 = vset.pattern.permute.xlu1 %v2047_v5  ;;  %1915 = vset.pattern.permute.xlu0 %v2047_v5 }
 0x2cc   : > { %v2611_v47 = vpop.xlane.xlu1 %965 }
 0x2cd   : > { %v1041_v30 = vrot.slane %v2611_v47, %v2626_v8 }
 0x2cf   : > { %v1046_v34 = vsel %vm1027_vm6, %v1045_v19, %v1041_v30 }
 0x2d0   : > { %v1095_v60 = vsel %vm1094_vm8, %v1046_v34, %v1093_v3 }
 0x2d2   : > { %v2617_v12 = vpop.xlane.xlu0 %974 }
 0x2d3   : > { %v1054_v26 = vrot.slane %v2617_v12, %v2633_v28 }
 0x2d4   : > { %v2615_v57 = vpop.xlane.xlu1 %971 }
 0x2d5   : > { %v1050_v43 = vrot.slane %v2615_v57, %v2626_v8 }
 0x2d7   : > { %v1055_v11 = vsel %vm1027_vm6, %v1054_v26, %v1050_v43 }
 0x2d8   : > { %v1097_v43 = vsel %vm1096_vm9, %v1055_v11, %v1095_v60  ;;  %v1113_v11 = vsub.s32 0, %v2623_v4 }
 0x2da   : > { %v2621_v1 = vpop.xlane.xlu0 %980 }
 0x2db   : > { %v1063_v53 = vrot.slane %v2621_v1, %v2633_v28 }
 0x2dc   : > { %v2619_v61 = vpop.xlane.xlu1 %977 }
 0x2dd   : > { %v1059_v16 = vrot.slane %v2619_v61, %v2626_v8 }
 0x2df   : > { %v1064_v14 = vsel %vm1027_vm6, %v1063_v53, %v1059_v16 }
 0x2e0   : > { %v1099_v53 = vsel %vm1098_vm10, %v1064_v14, %v1097_v43 }
 0x2e2   : > { %v2630_v10 = vpop.xlane.xlu0 %986 }
 0x2e3   : > { %v1072_v18 = vrot.slane %v2630_v10, %v2633_v28 }
 0x2e4   : > { %v2628_v9 = vpop.xlane.xlu1 %983 }
 0x2e5   : > { %v1068_v29 = vrot.slane %v2628_v9, %v2626_v8 }
 0x2e7   : > { %v1073_v15 = vsel %vm1027_vm6, %v1072_v18, %v1068_v29  ;;  %v1117_v18 = vsub.s32 1, %v2623_v4 }
 0x2e8   : > { %v1101_v3 = vsel %vm1100_vm11, %v1073_v15, %v1099_v53  ;;  %v1129_v15 = vsub.s32 4, %v2623_v4  ;;  %v2946_v53 = vsub.s32 5, %v2623_v4 }
 0x2ea   : > { %v2651_v20 = vpop.xlane.xlu0 %992 }
 0x2eb   : > { %v1081_v30 = vrot.slane %v2651_v20, %v2633_v28 }
 0x2ec   : > { %v2645_v45 = vpop.xlane.xlu1 %989 }
 0x2ed   : > { %v1077_v62 = vrot.slane %v2645_v45, %v2626_v8 }
 0x2ef   : > { %v1082_v26 = vsel %vm1027_vm6, %v1081_v30, %v1077_v62 }
 0x2f0   : > { %v1103_v60 = vsel %vm1102_vm12, %v1082_v26, %v1101_v3 }
 0x2f2   : > { %v2673_v19 = vpop.xlane.xlu0 %998 }
 0x2f3   : > { %v1090_v16 = vrot.slane %v2673_v19, %v2633_v28 }
 0x2f4   : > { %v2678_v21 = vpop.xlane.xlu1 %995 }
 0x2f5   : > { %v1086_v23 = vrot.slane %v2678_v21, %v2626_v8 }
 0x2f7   : > { %v1091_v29 = vsel %vm1027_vm6, %v1090_v16, %v1086_v23  ;;  %v1121_v23 = vsub.s32 2, %v2623_v4 }
 0x2f8   : > { %v1105_v34 = vsel %vm1104_vm13, %v1091_v29, %v1103_v60 }
 0x2f9   : > { %v1107_v62 = vsel %vm951_vm5, %v1105_v34, -inf }
 0x2fa   : > { %1108 = vmax.xlane.f32.xlu1 %v1107_v62  ;;  %v2945_v62 = vsub.s32 6, %v2623_v4 }
 0x383   : > { %v1109_v14 = vpop.xlane.xlu1 %1108 }
 0x384   : > { %v1114_v30 = vrot.slane %v1109_v14, %v1113_v11  ;;  %v1118_v43 = vrot.slane %v1109_v14, %v1117_v18  ;;  %v1130_v3 = vrot.slane %v1109_v14, %v1129_v15  ;;  %v1122_v5 = vrot.slane %v1109_v14, %v1121_v23 }
 0x385   : > { %v1138_v55 = vrot.slane %v1109_v14, %v2945_v62 }
 0x386   : > { %v1151_v26 = vsub.f32 %v2603_v17, %v1114_v30  ;;  %v1152_v16 = vsub.f32 %v2609_v44, %v1114_v30  ;;  %v1153_v29 = vsub.f32 %v2607_v33, %v1118_v43  ;;  %v1154_v17 = vsub.f32 %v2605_v39, %v1118_v43 }
 0x387   : > { %v1134_v44 = vrot.slane %v1109_v14, %v2946_v53  ;;  %v1160_v30 = vsub.f32 %v2621_v1, %v1130_v3  ;;  %v1141_v33 = vsub.s32 7, %v2623_v4  ;;  %v1156_v1 = vsub.f32 %v2613_v50, %v1122_v5 }
 0x388   : > { %v1167_v60 = vmul.f32 1.442695, %v1151_v26  ;;  %v1169_v34 = vmul.f32 1.442695, %v1152_v16  ;;  %v1171_v0 = vmul.f32 1.442695, %v1153_v29  ;;  %v1155_v26 = vsub.f32 %v2611_v47, %v1122_v5 }
 0x389   : > { %v1173_v16 = vmul.f32 1.442695, %v1154_v17  ;;  %v1162_v39 = vsub.f32 %v2630_v10, %v1134_v44  ;;  %v1185_v43 = vmul.f32 1.442695, %v1160_v30  ;;  %v1164_v47 = vsub.f32 %v2651_v20, %v1138_v55 }
 0x38a   : > { %1949 = vpow2.f32 %v1167_v60  ;;  %v1126_v60 = vrot.slane %v1109_v14, %v2947_v56  ;;  %v1175_v29 = vmul.f32 1.442695, %v1155_v26  ;;  %v1177_v10 = vmul.f32 1.442695, %v1156_v1 }
 0x38b   : > { %1951 = vpow2.f32 %v1169_v34  ;;  %v1142_v34 = vrot.slane %v1109_v14, %v1141_v33  ;;  %v1189_v17 = vmul.f32 1.442695, %v1162_v39  ;;  %v1193_v41 = vmul.f32 1.442695, %v1164_v47 }
 0x38c   : > { %1953 = vpow2.f32 %v1171_v0  ;;  %v1157_v51 = vsub.f32 %v2615_v57, %v1126_v60  ;;  %v1158_v14 = vsub.f32 %v2617_v12, %v1126_v60  ;;  %v1159_v26 = vsub.f32 %v2619_v61, %v1130_v3 }
 0x38d   : > { %1955 = vpow2.f32 %v1173_v16  ;;  %v1166_v30 = vsub.f32 %v2673_v19, %v1142_v34  ;;  %v1163_v3 = vsub.f32 %v2645_v45, %v1138_v55 }
 0x38e   : > { %1957 = vpow2.f32 %v1185_v43  ;;  %v1179_v20 = vmul.f32 1.442695, %v1157_v51  ;;  %v1181_v16 = vmul.f32 1.442695, %v1158_v14  ;;  %v1183_v12 = vmul.f32 1.442695, %v1159_v26 }
 0x38f   : > { %1959 = vpow2.f32 %v1175_v29  ;;  %v1197_v57 = vmul.f32 1.442695, %v1166_v30  ;;  %v1191_v29 = vmul.f32 1.442695, %v1163_v3 }
 0x390   : > { %1961 = vpow2.f32 %v1189_v17 }
 0x391   : > { %1963 = vpow2.f32 %v1177_v10 }
 0x392   : > { %1965 = vpow2.f32 %v1193_v41  ;;  %v1161_v41 = vsub.f32 %v2628_v9, %v1134_v44  ;;  %v1165_v44 = vsub.f32 %v2678_v21, %v1142_v34 }
 0x393   : > { %1967 = vpow2.f32 %v1179_v20 }
 0x394   : > { %1969 = vpow2.f32 %v1197_v57  ;;  %v1187_v60 = vmul.f32 1.442695, %v1161_v41  ;;  %v1195_v55 = vmul.f32 1.442695, %v1165_v44 }
 0x395   : > { %1971 = vpow2.f32 %v1181_v16 }
 0x396   : > { %1973 = vpow2.f32 %v1183_v12 }
 0x397   : > { %v2725_v0 = vpop.eup %1949  ;;  %1975 = vpow2.f32 %v1187_v60 }
 0x398   : > { %v2728_v50 = vpop.eup %1951  ;;  %1216 = vperm.xlu0 %1915, %v2725_v0   ;;  %1977 = vpow2.f32 %v1191_v29 }
 0x399   : > { %1219 = vperm.xlu1 %1916, %v2728_v50   ;;  %v2733_v5 = vpop.eup %1953  ;;  %1979 = vpow2.f32 %v1195_v55 }
 0x39a   : > { %v2736_v19 = vpop.eup %1955 }
 0x39b   : > { %v2739_v39 = vpop.eup %1957 }
 0x39c   : > { %1243 = vperm.xlu0 %1915, %v2739_v39   ;;  %v2743_v51 = vpop.eup %1959 }
 0x39d   : > { %1222 = vperm.xlu1 %1916, %v2733_v5   ;;  %v2746_v43 = vpop.eup %1961 }
 0x39e   : > { %v2750_v61 = vpop.eup %1963 }
 0x39f   : > { %v2753_v1 = vpop.eup %1965 }
 0x3a0   : > { %1249 = vperm.xlu0 %1915, %v2746_v43   ;;  %v2757_v9 = vpop.eup %1967 }
 0x3a1   : > { %1225 = vperm.xlu1 %1916, %v2736_v19   ;;  %v2760_v47 = vpop.eup %1969 }
 0x3a2   : > { %v2764_v45 = vpop.eup %1971 }
 0x3a3   : > { %v2767_v17 = vpop.eup %1973 }
 0x3a4   : > { %1255 = vperm.xlu0 %1915, %v2753_v1   ;;  %v2770_v21 = vpop.eup %1975 }
 0x3a5   : > { %1228 = vperm.xlu1 %1916, %v2743_v51   ;;  %v2773_v34 = vpop.eup %1977 }
 0x3a6   : > { %v1980_v10 = vpop.eup %1979 }
 0x3a8   : > { %1261 = vperm.xlu0 %1915, %v2760_v47  }
 0x3a9   : > { %1231 = vperm.xlu1 %1916, %v2750_v61  }
 0x3ad   : > { %1234 = vperm.xlu1 %1916, %v2757_v9  }
 0x3b1   : > { %1237 = vperm.xlu1 %1916, %v2764_v45  }
 0x3b5   : > { %1240 = vperm.xlu1 %1916, %v2767_v17  }
 0x3b9   : > { %1246 = vperm.xlu1 %1916, %v2770_v21  }
 0x3bd   : > { %1252 = vperm.xlu1 %1916, %v2773_v34  }
 0x3c1   : > { %1258 = vperm.xlu1 %1916, %v1980_v10  }
 0x413   : > { %v1217_v26 = vpop.permute.xlu0 %1216 }
 0x414   : > { %v1220_v30 = vpop.permute.xlu1 %1219  ;;  %v1266_v42 = vrot.slane %v1217_v26, %v2626_v8 }
 0x415   : > { %v1270_v37 = vrot.slane %v1220_v30, %v2633_v28 }
 0x417   : > { %v1244_v41 = vpop.permute.xlu0 %1243  ;;  %v1271_v26 = vsel %vm1027_vm6, %v1270_v37, %v1266_v42 }
 0x418   : > { %v1223_v20 = vpop.permute.xlu1 %1222 }
 0x419   : > { %v1275_v31 = vrot.slane %v1223_v20, %v2626_v8 }
 0x41b   : > { %v1250_v60 = vpop.permute.xlu0 %1249 }
 0x41c   : > { %v1226_v14 = vpop.permute.xlu1 %1225  ;;  %v1315_v20 = vrot.slane %v1250_v60, %v2633_v28 }
 0x41d   : > { %v1279_v29 = vrot.slane %v1226_v14, %v2633_v28 }
 0x41f   : > { %v1256_v55 = vpop.permute.xlu0 %1255  ;;  %v1280_v62 = vsel %vm1027_vm6, %v1279_v29, %v1275_v31 }
 0x420   : > { %v1229_v57 = vpop.permute.xlu1 %1228  ;;  %v1324_v31 = vrot.slane %v1256_v55, %v2633_v28 }
 0x421   : > { %v1284_v38 = vrot.slane %v1229_v57, %v2626_v8 }
 0x424   : > { %v1232_v16 = vpop.permute.xlu1 %1231 }
 0x425   : > { %v1288_v25 = vrot.slane %v1232_v16, %v2633_v28  ;;  %v1306_v16 = vrot.slane %v1244_v41, %v2633_v28 }
 0x427   : > { %v1289_v30 = vsel %vm1027_vm6, %v1288_v25, %v1284_v38 }
 0x428   : > { %v1235_v12 = vpop.permute.xlu1 %1234 }
 0x429   : > { %v1293_v14 = vrot.slane %v1235_v12, %v2626_v8  ;;  %v1262_v12 = vpop.permute.xlu0 %1261 }
 0x42c   : > { %v1238_v3 = vpop.permute.xlu1 %1237 }
 0x42d   : > { %v1297_v6 = vrot.slane %v1238_v3, %v2633_v28 }
 0x42f   : > { %v1298_v3 = vsel %vm1027_vm6, %v1297_v6, %v1293_v14  ;;  %v1333_v6 = vrot.slane %v1262_v12, %v2633_v28  ;;  %v2952_v12 = vsub.s32 6, %v2623_v4 }
 0x430   : > { %v1241_v44 = vpop.permute.xlu1 %1240 }
 0x431   : > { %v1302_v32 = vrot.slane %v1241_v44, %v2626_v8  ;;  %v1335_v44 = vsel %vm1092_vm7, %v1280_v62, %v1271_v26 }
 0x432   : > { %v1336_v41 = vsel %vm1094_vm8, %v1289_v30, %v1335_v44 }
 0x433   : > { %v1337_v38 = vsel %vm1096_vm9, %v1298_v3, %v1336_v41 }
 0x434   : > { %v1247_v48 = vpop.permute.xlu1 %1246 }
 0x435   : > { %v1311_v53 = vrot.slane %v1247_v48, %v2626_v8  ;;  %v1307_v48 = vsel %vm1027_vm6, %v1306_v16, %v1302_v32 }
 0x437   : > { %v1316_v25 = vsel %vm1027_vm6, %v1315_v20, %v1311_v53 }
 0x438   : > { %v1253_v56 = vpop.permute.xlu1 %1252 }
 0x439   : > { %v1320_v57 = vrot.slane %v1253_v56, %v2626_v8  ;;  %v1338_v56 = vsel %vm1098_vm10, %v1307_v48, %v1337_v38 }
 0x43a   : > { %v1339_v60 = vsel %vm1100_vm11, %v1316_v25, %v1338_v56 }
 0x43b   : > { %v1325_v37 = vsel %vm1027_vm6, %v1324_v31, %v1320_v57 }
 0x43c   : > { %v1259_v42 = vpop.permute.xlu1 %1258  ;;  %v1340_v32 = vsel %vm1102_vm12, %v1325_v37, %v1339_v60 }
 0x43d   : > { %v1329_v62 = vrot.slane %v1259_v42, %v2626_v8 }
 0x43f   : > { %v1334_v29 = vsel %vm1027_vm6, %v1333_v6, %v1329_v62 }
 0x440   : > { %v1341_v55 = vsel %vm1104_vm13, %v1334_v29, %v1340_v32  ;;  %v2955_v29 = vmax.f32 %v2465_v22, 0.0  ;;  %v2956_v32 = vmax.f32 %v2477_v7, 0.0 }
 0x441   : > { %v1343_v53 = vsel %vm951_vm5, %v1341_v55, 0.0 }
 0x442   : > { %1344 = vadd.xlane.f32.xlu1 %v1343_v53  ;;  %v2957_v53 = vmax.f32 %v2495_v40, 0.0 }
 0x4cb   : > { %v1345_v14 = vpop.xlane.xlu1 %1344 }
 0x4cc   : > { %1981 = vrcp.f32 %v1345_v14 }
 0x4d9   : > { %v1982_v16 = vpop.eup %1981 }
 0x4da   : > { %v1367_v28 = vrot.slane %v1982_v16, %v1129_v15  ;;  %v1351_v8 = vrot.slane %v1982_v16, %v1113_v11  ;;  %v1379_v20 = vrot.slane %v1982_v16, %v1141_v33  ;;  %v1355_v44 = vrot.slane %v1982_v16, %v1117_v18 }
 0x4db   : > { %v1375_v48 = vrot.slane %v1982_v16, %v2952_v12 }
 0x4dc   : > { %v1397_v30 = vmul.f32 %v2739_v39, %v1367_v28  ;;  %v1388_v26 = vmul.f32 %v2725_v0, %v1351_v8  ;;  %v1402_v3 = vmul.f32 %v1980_v10, %v1379_v20  ;;  %v1389_v57 = vmul.f32 %v2728_v50, %v1351_v8 }
 0x4dd   : > { %v1390_v15 = vmul.f32 %v2733_v5, %v1355_v44  ;;  %v1391_v11 = vmul.f32 %v2736_v19, %v1355_v44  ;;  %v1359_v0 = vrot.slane %v1982_v16, %v1121_v23  ;;  %v2950_v50 = vsub.s32 3, %v2623_v4 }
 0x4de   : > { %1451 = vperm.xlu1 %1916, %v1397_v30   ;;  %1406 = vperm.xlu0 %1915, %v1388_v26   ;;  %v1396_v19 = vmul.f32 %v2767_v17, %v1367_v28  ;;  %v2951_v23 = vsub.s32 5, %v2623_v4  ;;  %v1403_v17 = vmul.f32 %v2760_v47, %v1379_v20  ;;  %v2953_v4 = vmax.f32 %v2475_v27, 0.0 }
 0x4df   : > { %v1392_v33 = vmul.f32 %v2743_v51, %v1359_v0  ;;  %v1393_v39 = vmul.f32 %v2750_v61, %v1359_v0  ;;  %v1363_v10 = vrot.slane %v1982_v16, %v2950_v50  ;;  %v2959_v27 = vmax.f32 %v2507_v49, 0.0 }
 0x4e0   : > { %v1371_v31 = vrot.slane %v1982_v16, %v2951_v23  ;;  %v2958_v16 = vmax.f32 %v2487_v36, 0.0  ;;  %v2961_v20 = vmax.f32 %v2497_v35, 0.0 }
 0x4e1   : > { %v1394_v18 = vmul.f32 %v2757_v9, %v1363_v10  ;;  %v1395_v5 = vmul.f32 %v2764_v45, %v1363_v10  ;;  %v1400_v9 = vmul.f32 %v2773_v34, %v1375_v48  ;;  %v1401_v45 = vmul.f32 %v2753_v1, %v1375_v48 }
 0x4e2   : > { %1476 = vperm.xlu1 %1916, %v1402_v3   ;;  %1411 = vperm.xlu0 %1915, %v1389_v57   ;;  %v1398_v51 = vmul.f32 %v2770_v21, %v1371_v31  ;;  %v1399_v61 = vmul.f32 %v2746_v43, %v1371_v31  ;;  %v2954_v34 = vmax.f32 %v2485_v13, 0.0  ;;  %v2960_v13 = vmax.f32 %v2467_v24, 0.0 }
 0x4e3   : > { %v2962_v3 = vmax.f32 %v2505_v46, 0.0  ;;  %v2963_v24 = vmax.f32 %v2517_v54, 0.0  ;;  %v2964_v10 = vmax.f32 %v2515_v52, 0.0 }
 0x4e6   : > { %1416 = vperm.xlu0 %1915, %v1390_v15  }
 0x4ea   : > { %1421 = vperm.xlu0 %1915, %v1391_v11  }
 0x4ee   : > { %1426 = vperm.xlu0 %1915, %v1392_v33  }
 0x4f2   : > { %1431 = vperm.xlu0 %1915, %v1393_v39  }
 0x4f6   : > { %1436 = vperm.xlu0 %1915, %v1394_v18  }
 0x4fa   : > { %1441 = vperm.xlu0 %1915, %v1395_v5  }
 0x4fe   : > { %1446 = vperm.xlu0 %1915, %v1396_v19  }
 0x502   : > { %1456 = vperm.xlu0 %1915, %v1398_v51  }
 0x506   : > { %1461 = vperm.xlu0 %1915, %v1399_v61  }
 0x50a   : > { %1466 = vperm.xlu0 %1915, %v1400_v9  }
 0x50e   : > { %1471 = vperm.xlu0 %1915, %v1401_v45  }
 0x512   : > { %1481 = vperm.xlu0 %1915, %v1403_v17  }
 0x559   : > { %v1407_v41 = vpop.permute.xlu0 %1406  ;;  %v1452_v1 = vpop.permute.xlu1 %1451 }
 0x55a   : > { %v1484_v30 = vmul.f32 %v1407_v41, %v2960_v13  ;;  %v1493_v7 = vmul.f32 %v1452_v1, %v2962_v3 }
 0x55d   : > { %v1412_v25 = vpop.permute.xlu0 %1411  ;;  %v1477_v41 = vpop.permute.xlu1 %1476 }
 0x55e   : > { %v1485_v47 = vmul.f32 %v1412_v25, %v2955_v29 }
 0x560   : > { %v1500_v40 = vadd.f32 %v1485_v47, %v1484_v30 }
 0x561   : > { %v1417_v38 = vpop.permute.xlu0 %1416 }
 0x562   : > { %v1486_v55 = vmul.f32 %v1417_v38, %v2956_v32  ;;  %v1501_v49 = vrot.slane %v1500_v40, 4  ;;  %v2965_v38 = vmax.f32 %v2527_v59, 0.0  ;;  %v2968_v32 = vmax.f32 %v2535_v63, 0.0 }
 0x564   : > { %v1502_v31 = vadd.f32 %v1501_v49, %v1500_v40 }
 0x565   : > { %v1422_v21 = vpop.permute.xlu0 %1421 }
 0x566   : > { %v1487_v56 = vmul.f32 %v1422_v21, %v2953_v4  ;;  %v1503_v25 = vrot.slane %v1502_v31, 2  ;;  %v2966_v21 = vmax.f32 %v2525_v58, 0.0 }
 0x568   : > { %v1507_v26 = vadd.f32 %v1487_v56, %v1486_v55  ;;  %v2967_v56 = vmax.f32 %v2537_v2, 0.0  ;;  %v1504_v1 = vadd.f32 %v1503_v25, %v1502_v31 }
 0x569   : > { %v1427_v37 = vpop.permute.xlu0 %1426 }
 0x56a   : > { %v1488_v28 = vmul.f32 %v1427_v37, %v2958_v16  ;;  %v1508_v36 = vrot.slane %v1507_v26, 4 }
 0x56c   : > { %v1509_v5 = vadd.f32 %v1508_v36, %v1507_v26 }
 0x56d   : > { %v1432_v42 = vpop.permute.xlu0 %1431 }
 0x56e   : > { %v1489_v62 = vmul.f32 %v1432_v42, %v2954_v34  ;;  %v1510_v48 = vrot.slane %v1509_v5, 2  ;;  %v1498_v34 = vmul.f32 %v1477_v41, %v2967_v56 }
 0x570   : > { %v1514_v57 = vadd.f32 %v1489_v62, %v1488_v28 }
 0x571   : > { %v1437_v43 = vpop.permute.xlu0 %1436 }
 0x572   : > { %v1490_v22 = vmul.f32 %v1437_v43, %v2961_v20  ;;  %v1515_v0 = vrot.slane %v1514_v57, 4  ;;  %v1511_v43 = vadd.f32 %v1510_v48, %v1509_v5 }
 0x574   : > { %v1516_v19 = vadd.f32 %v1515_v0, %v1514_v57  ;;  %v1512_v58 = vrot.slane %v1511_v43, 1 }
 0x575   : > { %v1442_v6 = vpop.permute.xlu0 %1441 }
 0x576   : > { %v1491_v14 = vmul.f32 %v1442_v6, %v2957_v53  ;;  %v1517_v45 = vrot.slane %v1516_v19, 2  ;;  %v1513_v26 = vadd.f32 %v1512_v58, %v1511_v43 }
 0x578   : > { %v1521_v15 = vadd.f32 %v1491_v14, %v1490_v22  ;;  %v1518_v62 = vadd.f32 %v1517_v45, %v1516_v19 }
 0x579   : > { %v1447_v60 = vpop.permute.xlu0 %1446 }
 0x57a   : > { %v1492_v8 = vmul.f32 %v1447_v60, %v2959_v27  ;;  %v1522_v39 = vrot.slane %v1521_v15, 4  ;;  %v1519_v28 = vrot.slane %v1518_v62, 1  ;;  %v1505_v27 = vrot.slane %v1504_v1, 1 }
 0x57c   : > { %v1528_v11 = vadd.f32 %v1493_v7, %v1492_v8  ;;  %v1523_v51 = vadd.f32 %v1522_v39, %v1521_v15  ;;  %v1520_v63 = vadd.f32 %v1519_v28, %v1518_v62  ;;  %v1506_v7 = vadd.f32 %v1505_v27, %v1504_v1 }
 0x57d   : > { %v1457_v44 = vpop.permute.xlu0 %1456 }
 0x57e   : > { %v1494_v50 = vmul.f32 %v1457_v44, %v2963_v24  ;;  %v1529_v18 = vrot.slane %v1528_v11, 4  ;;  %v1524_v54 = vrot.slane %v1523_v51, 2 }
 0x580   : > { %v1530_v12 = vadd.f32 %v1529_v18, %v1528_v11  ;;  %v1525_v29 = vadd.f32 %v1524_v54, %v1523_v51  ;;  %v1564_v11 = vsel %vm1092_vm7, %v1513_v26, %v1506_v7 }
 0x581   : > { %v1462_v33 = vpop.permute.xlu0 %1461 }
 0x582   : > { %v1495_v35 = vmul.f32 %v1462_v33, %v2964_v10  ;;  %v1531_v42 = vrot.slane %v1530_v12, 2  ;;  %v1526_v8 = vrot.slane %v1525_v29, 1  ;;  %v1565_v33 = vsel %vm1094_vm8, %v1520_v63, %v1564_v11 }
 0x584   : > { %v1535_v46 = vadd.f32 %v1495_v35, %v1494_v50  ;;  %v1532_v55 = vadd.f32 %v1531_v42, %v1530_v12  ;;  %v1527_v57 = vadd.f32 %v1526_v8, %v1525_v29 }
 0x585   : > { %v1467_v23 = vpop.permute.xlu0 %1466 }
 0x586   : > { %v1536_v61 = vrot.slane %v1535_v46, 4  ;;  %v1496_v52 = vmul.f32 %v1467_v23, %v2965_v38  ;;  %v1533_v30 = vrot.slane %v1532_v55, 1  ;;  %v1566_v39 = vsel %vm1096_vm9, %v1527_v57, %v1565_v33 }
 0x588   : > { %v1537_v9 = vadd.f32 %v1536_v61, %v1535_v46  ;;  %v1534_v15 = vadd.f32 %v1533_v30, %v1532_v55 }
 0x589   : > { %v1472_v17 = vpop.permute.xlu0 %1471 }
 0x58a   : > { %v1497_v37 = vmul.f32 %v1472_v17, %v2966_v21  ;;  %v1538_v6 = vrot.slane %v1537_v9, 2  ;;  %v1567_v50 = vsel %vm1098_vm10, %v1534_v15, %v1566_v39 }
 0x58c   : > { %v1542_v4 = vadd.f32 %v1497_v37, %v1496_v52  ;;  %v1539_v53 = vadd.f32 %v1538_v6, %v1537_v9 }
 0x58d   : > { %v1482_v60 = vpop.permute.xlu0 %1481 }
 0x58e   : > { %v1543_v47 = vrot.slane %v1542_v4, 4  ;;  %v1499_v59 = vmul.f32 %v1482_v60, %v2968_v32  ;;  %v1540_v20 = vrot.slane %v1539_v53, 1 }
 0x590   : > { %v1544_v14 = vadd.f32 %v1543_v47, %v1542_v4  ;;  %v1549_v16 = vadd.f32 %v1499_v59, %v1498_v34  ;;  %v1541_v36 = vadd.f32 %v1540_v20, %v1539_v53 }
 0x592   : > { %v1545_v2 = vrot.slane %v1544_v14, 2  ;;  %v1550_v13 = vrot.slane %v1549_v16, 4  ;;  %v1568_v35 = vsel %vm1100_vm11, %v1541_v36, %v1567_v50 }
 0x594   : > { %v1546_v22 = vadd.f32 %v1545_v2, %v1544_v14  ;;  %v1551_v3 = vadd.f32 %v1550_v13, %v1549_v16 }
 0x596   : > { %v1547_v44 = vrot.slane %v1546_v22, 1  ;;  %v1552_v40 = vrot.slane %v1551_v3, 2 }
 0x598   : > { %v1553_v0 = vadd.f32 %v1552_v40, %v1551_v3  ;;  %v1548_v49 = vadd.f32 %v1547_v44, %v1546_v22 }
 0x59a   : > { %v1554_v24 = vrot.slane %v1553_v0, 1  ;;  %v1569_v18 = vsel %vm1102_vm12, %v1548_v49, %v1568_v35 }
 0x59c   : > { %v1555_v10 = vadd.f32 %v1554_v24, %v1553_v0 }
 0x59e   : > { %v1570_v5 = vsel %vm1104_vm13, %v1555_v10, %v1569_v18 }
 0x59f   : > { %1572 = vst [vmem:[%s247_s28] sm:$0xff] %v1570_v5 }
 0x5a0   : > { %1996 = shalt.err (!%p1993_p3)
}
 0x5a1   : > { %s1997_s17 = scalar_lea.hbm %s2884_s12, 128  ;;  %s2001_s20 = scalar_lea.hbm %s2928_s6, 256 }
 0x5a2   : > { %p1998_p4 = scmp.ne.s32.totalorder %s2884_s12, %s1997_s17  ;;  %p2002_p9 = scmp.lt.s32.totalorder %s2884_s12, %s2928_s6 }
 0x5a3   : > { %p2003_p10 = scmp.lt.s32.totalorder %s2001_s20, %s1997_s17 }
 0x5a4   : > { %p1999_p7 = pnand %p1998_p4, %p2122_p5 }
 0x5a5   : > { %p2004_p11 = por %p2003_p10, %p2002_p9 }
 0x5a6   : > { %p2000_p8 = pneg %p1999_p7 }
 0x5a8   : > { %p2005_p12 = pnand %p2004_p11, %p2000_p8 }
 0x5aa   : > { %2008 = shalt.err (!%p2005_p12)
}
 0x5ab   : > { %1873 = dma.vmem_to_hbm [thread:$0]  (%p2122_p5), %s1588_s10, 128, %s2884_s12, %s1574_s25  }
 0x5ac PF: > { %p1879_p13 = scmp.ge.s32.totalorder %s2043_s24, 2  ;;  %s1599_s28 = sand.u32 1, %s2031_s21  }
 0x5ad   : > { %s1600_s9 = scalar_lea.sflag [#allocation3], %s1599_s28 }
 0x5ae   : > { %p1876_p0 = pnand %p1879_p13, %p2126_p6 }
 0x5b0   : > { %p1877_p1 = pneg %p1876_p0 }
 0x5b2   : > { %2026 = dma.done.wait (%p1877_p1), %s1600_s9, 128  }
 0x5b3   : > { %2028 = vsyncadd (%p1877_p1), %s1600_s9, 4294967168  ;;  %p16_p2 = scmp.ge.s32.totalorder %s2109_s27, 4   ;;  %s2969_s21 = smov %s2035_s22 }
 0x5b4   : > { %s2970_s22 = smov %s2039_s23  ;;  %s2971_s23 = smov %s2120_s30 }
 0x5b5   : > { %s2972_s24 = smov %s2109_s27  ;;  %18 = sbr.rel (!%p16_p2) target bundleno = 3 (0x3), region = 79 }
 0x5ba   :  { %1605 = vsyncpa [#allocation3], 1 }
 0x5bb   :  { %1607 = vsyncpa [#allocation3 + $0x1], 1 }

</bundles_post_ra>
